<compile_context>
chip_gen: v7x
topology: tpu7x:2x2x1
jax: 0.10.0
libtpu: 0.0.40
codegen_flags: <defaults>
</compile_context>

<pallas_src>
import math
import jax
import jax.numpy as jnp
from jax.experimental import pallas as pl
from jax.experimental.pallas import tpu as pltpu

N_CLASSES = 7


# ------------------------------- full forward ---------------------------------
def lstm_reg_forward(x, params):
    """x: (S, B, input_size) -> (S, B, N_CLASSES). Mirrors lstm_reg.forward."""
    assert len(params["lstm"]) == 2, "fused kernel is specialized to num_layers=2"
    S, B, I = x.shape
    lp1, lp2 = params["lstm"]
    H = lp1["w_hh"].shape[1]
    O = params["reg_w"].shape[0]
    O_pad = pl.cdiv(O, 128) * 128                   # lane-dense output width

    # One-time weight prep (transpose / bias-sum / stack / lane-pad) in wrapper.
    wih1_t = jnp.transpose(lp1["w_ih"])                              # (I, 4H)
    whh1_t = jnp.transpose(lp1["w_hh"])                              # (H, 4H)
    b1 = (lp1["b_ih"] + lp1["b_hh"]).reshape(1, 4 * H)               # (1, 4H)
    # Layer-2 merged weight: [h1 | h2] @ w2 == h1@Wih2^T + h2@Whh2^T
    w2 = jnp.concatenate([jnp.transpose(lp2["w_ih"]),
                          jnp.transpose(lp2["w_hh"])], axis=0)       # (2H, 4H)
    b2 = (lp2["b_ih"] + lp2["b_hh"]).reshape(1, 4 * H)               # (1, 4H)
    wr_pad = jnp.zeros((H, O_pad), jnp.float32).at[:, :O].set(
        jnp.transpose(params["reg_w"]))                              # (H, O_pad)
    br_pad = jnp.zeros((1, O_pad), jnp.float32).at[:, :O].set(params["reg_b"])

    # Time-major flatten: rows [t*B:(t+1)*B] of x2d are timestep t.
    x2d = x.reshape(S * B, I)

    def kernel(x_ref, wih1_ref, whh1_ref, b1_ref, w2_ref, b2_ref,
               wr_ref, br_ref, y_ref, h2_hist_ref):
        wih1 = wih1_ref[...]      # (I, 4H)
        whh1 = whh1_ref[...]      # (H, 4H)
        b1v = b1_ref[...]         # (1, 4H)
        w2v = w2_ref[...]         # (2H, 4H)
        b2v = b2_ref[...]         # (1, 4H)

        # Hoisted layer-1 input projection: all S timesteps in ONE MXU op.
        xg1 = jnp.dot(x_ref[...], wih1,
                      preferred_element_type=jnp.float32) + b1v       # (S*B, 4H)

        def sigmoid(v):
            # Exact identity, guaranteed single EUP push.
            return 0.5 * jnp.tanh(0.5 * v) + 0.5

        def cell(gates, c):
            # Whole-vreg nonlinearities (2 EUP pushes), slice gate lanes after.
            # PyTorch gate order: i, f, g, o.
            sg = sigmoid(gates)
            tg = jnp.tanh(gates)
            i = sg[:, 0 * H:1 * H]
            f = sg[:, 1 * H:2 * H]
            g = tg[:, 2 * H:3 * H]
            o = sg[:, 3 * H:4 * H]
            c_new = f * c + i * g
            h_new = o * jnp.tanh(c_new)
            return h_new, c_new

        h1 = jnp.zeros((B, H), jnp.float32)
        c1 = jnp.zeros((B, H), jnp.float32)
        h2 = jnp.zeros((B, H), jnp.float32)
        c2 = jnp.zeros((B, H), jnp.float32)

        # Static unroll: recurrence is inherently sequential; everything stays
        # on-chip. Per step: 1 dot (layer-1 hidden) + 1 dot (merged layer-2).
        for t in range(S):
            g1 = xg1[t * B:(t + 1) * B, :] + jnp.dot(
                h1, whh1, preferred_element_type=jnp.float32)
            h1, c1 = cell(g1, c1)

            h12 = jnp.concatenate([h1, h2], axis=1)              # (B, 2H)
            g2 = jnp.dot(h12, w2v, preferred_element_type=jnp.float32) + b2v
            h2, c2 = cell(g2, c2)

            # Park h2 rows in VMEM scratch (keeps register pressure bounded).
            h2_hist_ref[t * B:(t + 1) * B, :] = h2

        # Hoisted linear head: one (S*B,H)@(H,O_pad) dot + dense (16,128) store.
        y_ref[...] = (jnp.dot(h2_hist_ref[...], wr_ref[...],
                              preferred_element_type=jnp.float32) + br_ref[...])

    y2d = pl.pallas_call(
        kernel,
        out_shape=jax.ShapeDtypeStruct((S * B, O_pad), jnp.float32),
        grid_spec=pltpu.PrefetchScalarGridSpec(
            num_scalar_prefetch=0,
            grid=(1,),
            in_specs=[
                pl.BlockSpec((S * B, I), lambda i: (0, 0)),        # x (flat)
                pl.BlockSpec((I, 4 * H), lambda i: (0, 0)),        # W_ih1^T
                pl.BlockSpec((H, 4 * H), lambda i: (0, 0)),        # W_hh1^T
                pl.BlockSpec((1, 4 * H), lambda i: (0, 0)),        # b1
                pl.BlockSpec((2 * H, 4 * H), lambda i: (0, 0)),    # [Wih2;Whh2]^T
                pl.BlockSpec((1, 4 * H), lambda i: (0, 0)),        # b2
                pl.BlockSpec((H, O_pad), lambda i: (0, 0)),        # W_reg^T pad
                pl.BlockSpec((1, O_pad), lambda i: (0, 0)),        # b_reg pad
            ],
            out_specs=pl.BlockSpec((S * B, O_pad), lambda i: (0, 0)),
            scratch_shapes=[pltpu.VMEM((S * B, H), jnp.float32)],  # h2 history
        ),
        compiler_params=pltpu.CompilerParams(
            dimension_semantics=("arbitrary",)),
    )(x2d, wih1_t, whh1_t, b1, w2, b2, wr_pad, br_pad)

    return y2d[:, :O].reshape(S, B, O)              # x.view(s, b, -1)


# ----------------------------- param initialization ---------------------------
def init_params(key, input_size, hidden_size, output_size=N_CLASSES, num_layers=2):
    params = {"lstm": []}
    k = 1.0 / math.sqrt(hidden_size)
    for layer in range(num_layers):
        in_sz = input_size if layer == 0 else hidden_size
        key, k1, k2, k3, k4 = jax.random.split(key, 5)
        params["lstm"].append({
            "w_ih": jax.random.uniform(k1, (4 * hidden_size, in_sz),
                                       jnp.float32, -k, k),
            "w_hh": jax.random.uniform(k2, (4 * hidden_size, hidden_size),
                                       jnp.float32, -k, k),
            "b_ih": jax.random.uniform(k3, (4 * hidden_size,), jnp.float32, -k, k),
            "b_hh": jax.random.uniform(k4, (4 * hidden_size,), jnp.float32, -k, k),
        })
    key, k5, k6 = jax.random.split(key, 3)
    kr = 1.0 / math.sqrt(hidden_size)
    params["reg_w"] = jax.random.uniform(k5, (output_size, hidden_size),
                                         jnp.float32, -kr, kr)
    params["reg_b"] = jax.random.uniform(k6, (output_size,), jnp.float32, -kr, kr)
    return params


# ------------------------------ pure-JAX reference -----------------------------
def _ref_forward(x, params):
    h = x
    for lp in params["lstm"]:
        S, B, _ = h.shape
        H = lp["w_hh"].shape[1]
        hs = jnp.zeros((B, H), jnp.float32)
        cs = jnp.zeros((B, H), jnp.float32)
        outs = []
        for t in range(S):
            g = (h[t] @ lp["w_ih"].T + hs @ lp["w_hh"].T
                 + lp["b_ih"] + lp["b_hh"])
            i = jax.nn.sigmoid(g[:, 0 * H:1 * H])
            f = jax.nn.sigmoid(g[:, 1 * H:2 * H])
            gg = jnp.tanh(g[:, 2 * H:3 * H])
            o = jax.nn.sigmoid(g[:, 3 * H:4 * H])
            cs = f * cs + i * gg
            hs = o * jnp.tanh(cs)
            outs.append(hs)
        h = jnp.stack(outs, axis=0)
    S, B, H = h.shape
    y = h.reshape(S * B, H) @ params["reg_w"].T + params["reg_b"]
    return y.reshape(S, B, -1)


if __name__ == "__main__":
    SEQ, BATCH, INPUT, HIDDEN = 8, 2, 8, 32

    key = jax.random.PRNGKey(0)
    key, kx = jax.random.split(key)
    x = jax.random.normal(kx, (SEQ, BATCH, INPUT), jnp.float32)
    params = init_params(key, INPUT, HIDDEN)

    fwd = jax.jit(lstm_reg_forward)
    out = fwd(x, params)
    out = jax.block_until_ready(out)

    ref = _ref_forward(x, params)
    assert out.shape == (SEQ, BATCH, N_CLASSES)
    assert jnp.allclose(out, ref, atol=5e-4, rtol=5e-4)

    print("KERNEL_OK")
</pallas_src>

<mosaic_0001>
module attributes {stable_mosaic.version = 11 : i64} {
  func.func @kernel(%arg0: i32, %arg1: memref<16x8xf32, #tpu.memory_space<vmem>>, %arg2: memref<8x128xf32, #tpu.memory_space<vmem>>, %arg3: memref<32x128xf32, #tpu.memory_space<vmem>>, %arg4: memref<1x128xf32, #tpu.memory_space<vmem>>, %arg5: memref<64x128xf32, #tpu.memory_space<vmem>>, %arg6: memref<1x128xf32, #tpu.memory_space<vmem>>, %arg7: memref<32x128xf32, #tpu.memory_space<vmem>>, %arg8: memref<1x128xf32, #tpu.memory_space<vmem>>, %arg9: memref<16x128xf32, #tpu.memory_space<vmem>>, %arg10: memref<16x32xf32, #tpu.memory_space<vmem>>) attributes {dimension_semantics = [#tpu.dimension_semantics<arbitrary>], iteration_bounds = array<i64: 1>, scalar_prefetch = 0 : i64, scratch_operands = 1 : i64, tpu.core_type = #tpu.core_type<tc>, window_params = [{pipeline_mode = #tpu.pipeline_mode<synchronous>, transform_indices = @transform_0, window_bounds = array<i64: 16, 8>}, {pipeline_mode = #tpu.pipeline_mode<synchronous>, transform_indices = @transform_1, window_bounds = array<i64: 8, 128>}, {pipeline_mode = #tpu.pipeline_mode<synchronous>, transform_indices = @transform_2, window_bounds = array<i64: 32, 128>}, {pipeline_mode = #tpu.pipeline_mode<synchronous>, transform_indices = @transform_3, window_bounds = array<i64: 1, 128>}, {pipeline_mode = #tpu.pipeline_mode<synchronous>, transform_indices = @transform_4, window_bounds = array<i64: 64, 128>}, {pipeline_mode = #tpu.pipeline_mode<synchronous>, transform_indices = @transform_5, window_bounds = array<i64: 1, 128>}, {pipeline_mode = #tpu.pipeline_mode<synchronous>, transform_indices = @transform_6, window_bounds = array<i64: 32, 128>}, {pipeline_mode = #tpu.pipeline_mode<synchronous>, transform_indices = @transform_7, window_bounds = array<i64: 1, 128>}, {pipeline_mode = #tpu.pipeline_mode<synchronous>, transform_indices = @transform_8, window_bounds = array<i64: 16, 128>}]} {
    %c0 = arith.constant 0 : index
    %c0_0 = arith.constant 0 : index
    %0 = vector.load %arg2[%c0, %c0_0] : memref<8x128xf32, #tpu.memory_space<vmem>>, vector<8x128xf32>
    %c0_1 = arith.constant 0 : index
    %c0_2 = arith.constant 0 : index
    %1 = vector.load %arg3[%c0_1, %c0_2] : memref<32x128xf32, #tpu.memory_space<vmem>>, vector<32x128xf32>
    %c0_3 = arith.constant 0 : index
    %c0_4 = arith.constant 0 : index
    %2 = vector.load %arg4[%c0_3, %c0_4] : memref<1x128xf32, #tpu.memory_space<vmem>>, vector<1x128xf32>
    %c0_5 = arith.constant 0 : index
    %c0_6 = arith.constant 0 : index
    %3 = vector.load %arg5[%c0_5, %c0_6] : memref<64x128xf32, #tpu.memory_space<vmem>>, vector<64x128xf32>
    %c0_7 = arith.constant 0 : index
    %c0_8 = arith.constant 0 : index
    %4 = vector.load %arg6[%c0_7, %c0_8] : memref<1x128xf32, #tpu.memory_space<vmem>>, vector<1x128xf32>
    %c0_9 = arith.constant 0 : index
    %c0_10 = arith.constant 0 : index
    %5 = vector.load %arg1[%c0_9, %c0_10] : memref<16x8xf32, #tpu.memory_space<vmem>>, vector<16x8xf32>
    %cst = arith.constant dense<0.000000e+00> : vector<16x128xf32>
    %6 = tpu.matmul %5, %0, %cst {dimension_numbers = #tpu.dot_dimension_numbers<[1], [0], [0], [1], [0, 0, 1, 1], [], []>} : vector<16x8xf32>, vector<8x128xf32>, vector<16x128xf32> -> vector<16x128xf32>
    %7 = vector.broadcast %2 : vector<1x128xf32> to vector<16x128xf32>
    %8 = arith.addf %6, %7 : vector<16x128xf32>
    %cst_11 = arith.constant 0.000000e+00 : f32
    %9 = vector.broadcast %cst_11 : f32 to vector<2x32xf32>
    %cst_12 = arith.constant 0.000000e+00 : f32
    %10 = vector.broadcast %cst_12 : f32 to vector<2x32xf32>
    %cst_13 = arith.constant 0.000000e+00 : f32
    %11 = vector.broadcast %cst_13 : f32 to vector<2x32xf32>
    %cst_14 = arith.constant 0.000000e+00 : f32
    %12 = vector.broadcast %cst_14 : f32 to vector<2x32xf32>
    %13 = vector.extract_strided_slice %8 {offsets = [0, 0], sizes = [2, 128], strides = [1, 1]} : vector<16x128xf32> to vector<2x128xf32>
    %cst_15 = arith.constant dense<0.000000e+00> : vector<2x128xf32>
    %14 = tpu.matmul %9, %1, %cst_15 {dimension_numbers = #tpu.dot_dimension_numbers<[1], [0], [0], [1], [0, 0, 1, 1], [], []>} : vector<2x32xf32>, vector<32x128xf32>, vector<2x128xf32> -> vector<2x128xf32>
    %15 = arith.addf %13, %14 : vector<2x128xf32>
    %cst_16 = arith.constant 5.000000e-01 : f32
    %16 = vector.broadcast %cst_16 : f32 to vector<2x128xf32>
    %17 = arith.mulf %16, %15 : vector<2x128xf32>
    %18 = math.tanh %17 : vector<2x128xf32>
    %cst_17 = arith.constant 5.000000e-01 : f32
    %19 = vector.broadcast %cst_17 : f32 to vector<2x128xf32>
    %20 = arith.mulf %19, %18 : vector<2x128xf32>
    %cst_18 = arith.constant 5.000000e-01 : f32
    %21 = vector.broadcast %cst_18 : f32 to vector<2x128xf32>
    %22 = arith.addf %20, %21 : vector<2x128xf32>
    %23 = math.tanh %15 : vector<2x128xf32>
    %24 = vector.extract_strided_slice %22 {offsets = [0, 0], sizes = [2, 32], strides = [1, 1]} : vector<2x128xf32> to vector<2x32xf32>
    %25 = vector.extract_strided_slice %22 {offsets = [0, 32], sizes = [2, 32], strides = [1, 1]} : vector<2x128xf32> to vector<2x32xf32>
    %26 = vector.extract_strided_slice %23 {offsets = [0, 64], sizes = [2, 32], strides = [1, 1]} : vector<2x128xf32> to vector<2x32xf32>
    %27 = vector.extract_strided_slice %22 {offsets = [0, 96], sizes = [2, 32], strides = [1, 1]} : vector<2x128xf32> to vector<2x32xf32>
    %28 = arith.mulf %25, %10 : vector<2x32xf32>
    %29 = arith.mulf %24, %26 : vector<2x32xf32>
    %30 = arith.addf %28, %29 : vector<2x32xf32>
    %31 = math.tanh %30 : vector<2x32xf32>
    %32 = arith.mulf %27, %31 : vector<2x32xf32>
    %33 = tpu.concatenate %32, %11 in 1 : vector<2x32xf32>, vector<2x32xf32> -> vector<2x64xf32>
    %cst_19 = arith.constant dense<0.000000e+00> : vector<2x128xf32>
    %34 = tpu.matmul %33, %3, %cst_19 {dimension_numbers = #tpu.dot_dimension_numbers<[1], [0], [0], [1], [0, 0, 1, 1], [], []>} : vector<2x64xf32>, vector<64x128xf32>, vector<2x128xf32> -> vector<2x128xf32>
    %35 = vector.broadcast %4 : vector<1x128xf32> to vector<2x128xf32>
    %36 = arith.addf %34, %35 : vector<2x128xf32>
    %cst_20 = arith.constant 5.000000e-01 : f32
    %37 = vector.broadcast %cst_20 : f32 to vector<2x128xf32>
    %38 = arith.mulf %37, %36 : vector<2x128xf32>
    %39 = math.tanh %38 : vector<2x128xf32>
    %cst_21 = arith.constant 5.000000e-01 : f32
    %40 = vector.broadcast %cst_21 : f32 to vector<2x128xf32>
    %41 = arith.mulf %40, %39 : vector<2x128xf32>
    %cst_22 = arith.constant 5.000000e-01 : f32
    %42 = vector.broadcast %cst_22 : f32 to vector<2x128xf32>
    %43 = arith.addf %41, %42 : vector<2x128xf32>
    %44 = math.tanh %36 : vector<2x128xf32>
    %45 = vector.extract_strided_slice %43 {offsets = [0, 0], sizes = [2, 32], strides = [1, 1]} : vector<2x128xf32> to vector<2x32xf32>
    %46 = vector.extract_strided_slice %43 {offsets = [0, 32], sizes = [2, 32], strides = [1, 1]} : vector<2x128xf32> to vector<2x32xf32>
    %47 = vector.extract_strided_slice %44 {offsets = [0, 64], sizes = [2, 32], strides = [1, 1]} : vector<2x128xf32> to vector<2x32xf32>
    %48 = vector.extract_strided_slice %43 {offsets = [0, 96], sizes = [2, 32], strides = [1, 1]} : vector<2x128xf32> to vector<2x32xf32>
    %49 = arith.mulf %46, %12 : vector<2x32xf32>
    %50 = arith.mulf %45, %47 : vector<2x32xf32>
    %51 = arith.addf %49, %50 : vector<2x32xf32>
    %52 = math.tanh %51 : vector<2x32xf32>
    %53 = arith.mulf %48, %52 : vector<2x32xf32>
    %c0_23 = arith.constant 0 : index
    %c0_24 = arith.constant 0 : index
    %54 = vector.load %arg10[%c0_23, %c0_24] : memref<16x32xf32, #tpu.memory_space<vmem>>, vector<2x32xf32>
    tpu.vector_store %arg10[%c0_23, %c0_24], %53 {strides = array<i32>} : memref<16x32xf32, #tpu.memory_space<vmem>>, vector<2x32xf32>,
    %55 = vector.extract_strided_slice %8 {offsets = [2, 0], sizes = [2, 128], strides = [1, 1]} : vector<16x128xf32> to vector<2x128xf32>
    %cst_25 = arith.constant dense<0.000000e+00> : vector<2x128xf32>
    %56 = tpu.matmul %32, %1, %cst_25 {dimension_numbers = #tpu.dot_dimension_numbers<[1], [0], [0], [1], [0, 0, 1, 1], [], []>} : vector<2x32xf32>, vector<32x128xf32>, vector<2x128xf32> -> vector<2x128xf32>
    %57 = arith.addf %55, %56 : vector<2x128xf32>
    %cst_26 = arith.constant 5.000000e-01 : f32
    %58 = vector.broadcast %cst_26 : f32 to vector<2x128xf32>
    %59 = arith.mulf %58, %57 : vector<2x128xf32>
    %60 = math.tanh %59 : vector<2x128xf32>
    %cst_27 = arith.constant 5.000000e-01 : f32
    %61 = vector.broadcast %cst_27 : f32 to vector<2x128xf32>
    %62 = arith.mulf %61, %60 : vector<2x128xf32>
    %cst_28 = arith.constant 5.000000e-01 : f32
    %63 = vector.broadcast %cst_28 : f32 to vector<2x128xf32>
    %64 = arith.addf %62, %63 : vector<2x128xf32>
    %65 = math.tanh %57 : vector<2x128xf32>
    %66 = vector.extract_strided_slice %64 {offsets = [0, 0], sizes = [2, 32], strides = [1, 1]} : vector<2x128xf32> to vector<2x32xf32>
    %67 = vector.extract_strided_slice %64 {offsets = [0, 32], sizes = [2, 32], strides = [1, 1]} : vector<2x128xf32> to vector<2x32xf32>
    %68 = vector.extract_strided_slice %65 {offsets = [0, 64], sizes = [2, 32], strides = [1, 1]} : vector<2x128xf32> to vector<2x32xf32>
    %69 = vector.extract_strided_slice %64 {offsets = [0, 96], sizes = [2, 32], strides = [1, 1]} : vector<2x128xf32> to vector<2x32xf32>
    %70 = arith.mulf %67, %30 : vector<2x32xf32>
    %71 = arith.mulf %66, %68 : vector<2x32xf32>
    %72 = arith.addf %70, %71 : vector<2x32xf32>
    %73 = math.tanh %72 : vector<2x32xf32>
    %74 = arith.mulf %69, %73 : vector<2x32xf32>
    %75 = tpu.concatenate %74, %53 in 1 : vector<2x32xf32>, vector<2x32xf32> -> vector<2x64xf32>
    %cst_29 = arith.constant dense<0.000000e+00> : vector<2x128xf32>
    %76 = tpu.matmul %75, %3, %cst_29 {dimension_numbers = #tpu.dot_dimension_numbers<[1], [0], [0], [1], [0, 0, 1, 1], [], []>} : vector<2x64xf32>, vector<64x128xf32>, vector<2x128xf32> -> vector<2x128xf32>
    %77 = vector.broadcast %4 : vector<1x128xf32> to vector<2x128xf32>
    %78 = arith.addf %76, %77 : vector<2x128xf32>
    %cst_30 = arith.constant 5.000000e-01 : f32
    %79 = vector.broadcast %cst_30 : f32 to vector<2x128xf32>
    %80 = arith.mulf %79, %78 : vector<2x128xf32>
    %81 = math.tanh %80 : vector<2x128xf32>
    %cst_31 = arith.constant 5.000000e-01 : f32
    %82 = vector.broadcast %cst_31 : f32 to vector<2x128xf32>
    %83 = arith.mulf %82, %81 : vector<2x128xf32>
    %cst_32 = arith.constant 5.000000e-01 : f32
    %84 = vector.broadcast %cst_32 : f32 to vector<2x128xf32>
    %85 = arith.addf %83, %84 : vector<2x128xf32>
    %86 = math.tanh %78 : vector<2x128xf32>
    %87 = vector.extract_strided_slice %85 {offsets = [0, 0], sizes = [2, 32], strides = [1, 1]} : vector<2x128xf32> to vector<2x32xf32>
    %88 = vector.extract_strided_slice %85 {offsets = [0, 32], sizes = [2, 32], strides = [1, 1]} : vector<2x128xf32> to vector<2x32xf32>
    %89 = vector.extract_strided_slice %86 {offsets = [0, 64], sizes = [2, 32], strides = [1, 1]} : vector<2x128xf32> to vector<2x32xf32>
    %90 = vector.extract_strided_slice %85 {offsets = [0, 96], sizes = [2, 32], strides = [1, 1]} : vector<2x128xf32> to vector<2x32xf32>
    %91 = arith.mulf %88, %51 : vector<2x32xf32>
    %92 = arith.mulf %87, %89 : vector<2x32xf32>
    %93 = arith.addf %91, %92 : vector<2x32xf32>
    %94 = math.tanh %93 : vector<2x32xf32>
    %95 = arith.mulf %90, %94 : vector<2x32xf32>
    %c2 = arith.constant 2 : index
    %c0_33 = arith.constant 0 : index
    %96 = vector.load %arg10[%c2, %c0_33] : memref<16x32xf32, #tpu.memory_space<vmem>>, vector<2x32xf32>
    tpu.vector_store %arg10[%c2, %c0_33], %95 {strides = array<i32>} : memref<16x32xf32, #tpu.memory_space<vmem>>, vector<2x32xf32>,
    %97 = vector.extract_strided_slice %8 {offsets = [4, 0], sizes = [2, 128], strides = [1, 1]} : vector<16x128xf32> to vector<2x128xf32>
    %cst_34 = arith.constant dense<0.000000e+00> : vector<2x128xf32>
    %98 = tpu.matmul %74, %1, %cst_34 {dimension_numbers = #tpu.dot_dimension_numbers<[1], [0], [0], [1], [0, 0, 1, 1], [], []>} : vector<2x32xf32>, vector<32x128xf32>, vector<2x128xf32> -> vector<2x128xf32>
    %99 = arith.addf %97, %98 : vector<2x128xf32>
    %cst_35 = arith.constant 5.000000e-01 : f32
    %100 = vector.broadcast %cst_35 : f32 to vector<2x128xf32>
    %101 = arith.mulf %100, %99 : vector<2x128xf32>
    %102 = math.tanh %101 : vector<2x128xf32>
    %cst_36 = arith.constant 5.000000e-01 : f32
    %103 = vector.broadcast %cst_36 : f32 to vector<2x128xf32>
    %104 = arith.mulf %103, %102 : vector<2x128xf32>
    %cst_37 = arith.constant 5.000000e-01 : f32
    %105 = vector.broadcast %cst_37 : f32 to vector<2x128xf32>
    %106 = arith.addf %104, %105 : vector<2x128xf32>
    %107 = math.tanh %99 : vector<2x128xf32>
    %108 = vector.extract_strided_slice %106 {offsets = [0, 0], sizes = [2, 32], strides = [1, 1]} : vector<2x128xf32> to vector<2x32xf32>
    %109 = vector.extract_strided_slice %106 {offsets = [0, 32], sizes = [2, 32], strides = [1, 1]} : vector<2x128xf32> to vector<2x32xf32>
    %110 = vector.extract_strided_slice %107 {offsets = [0, 64], sizes = [2, 32], strides = [1, 1]} : vector<2x128xf32> to vector<2x32xf32>
    %111 = vector.extract_strided_slice %106 {offsets = [0, 96], sizes = [2, 32], strides = [1, 1]} : vector<2x128xf32> to vector<2x32xf32>
    %112 = arith.mulf %109, %72 : vector<2x32xf32>
    %113 = arith.mulf %108, %110 : vector<2x32xf32>
    %114 = arith.addf %112, %113 : vector<2x32xf32>
    %115 = math.tanh %114 : vector<2x32xf32>
    %116 = arith.mulf %111, %115 : vector<2x32xf32>
    %117 = tpu.concatenate %116, %95 in 1 : vector<2x32xf32>, vector<2x32xf32> -> vector<2x64xf32>
    %cst_38 = arith.constant dense<0.000000e+00> : vector<2x128xf32>
    %118 = tpu.matmul %117, %3, %cst_38 {dimension_numbers = #tpu.dot_dimension_numbers<[1], [0], [0], [1], [0, 0, 1, 1], [], []>} : vector<2x64xf32>, vector<64x128xf32>, vector<2x128xf32> -> vector<2x128xf32>
    %119 = vector.broadcast %4 : vector<1x128xf32> to vector<2x128xf32>
    %120 = arith.addf %118, %119 : vector<2x128xf32>
    %cst_39 = arith.constant 5.000000e-01 : f32
    %121 = vector.broadcast %cst_39 : f32 to vector<2x128xf32>
    %122 = arith.mulf %121, %120 : vector<2x128xf32>
    %123 = math.tanh %122 : vector<2x128xf32>
    %cst_40 = arith.constant 5.000000e-01 : f32
    %124 = vector.broadcast %cst_40 : f32 to vector<2x128xf32>
    %125 = arith.mulf %124, %123 : vector<2x128xf32>
    %cst_41 = arith.constant 5.000000e-01 : f32
    %126 = vector.broadcast %cst_41 : f32 to vector<2x128xf32>
    %127 = arith.addf %125, %126 : vector<2x128xf32>
    %128 = math.tanh %120 : vector<2x128xf32>
    %129 = vector.extract_strided_slice %127 {offsets = [0, 0], sizes = [2, 32], strides = [1, 1]} : vector<2x128xf32> to vector<2x32xf32>
    %130 = vector.extract_strided_slice %127 {offsets = [0, 32], sizes = [2, 32], strides = [1, 1]} : vector<2x128xf32> to vector<2x32xf32>
    %131 = vector.extract_strided_slice %128 {offsets = [0, 64], sizes = [2, 32], strides = [1, 1]} : vector<2x128xf32> to vector<2x32xf32>
    %132 = vector.extract_strided_slice %127 {offsets = [0, 96], sizes = [2, 32], strides = [1, 1]} : vector<2x128xf32> to vector<2x32xf32>
    %133 = arith.mulf %130, %93 : vector<2x32xf32>
    %134 = arith.mulf %129, %131 : vector<2x32xf32>
    %135 = arith.addf %133, %134 : vector<2x32xf32>
    %136 = math.tanh %135 : vector<2x32xf32>
    %137 = arith.mulf %132, %136 : vector<2x32xf32>
    %c4 = arith.constant 4 : index
    %c0_42 = arith.constant 0 : index
    %138 = vector.load %arg10[%c4, %c0_42] : memref<16x32xf32, #tpu.memory_space<vmem>>, vector<2x32xf32>
    tpu.vector_store %arg10[%c4, %c0_42], %137 {strides = array<i32>} : memref<16x32xf32, #tpu.memory_space<vmem>>, vector<2x32xf32>,
    %139 = vector.extract_strided_slice %8 {offsets = [6, 0], sizes = [2, 128], strides = [1, 1]} : vector<16x128xf32> to vector<2x128xf32>
    %cst_43 = arith.constant dense<0.000000e+00> : vector<2x128xf32>
    %140 = tpu.matmul %116, %1, %cst_43 {dimension_numbers = #tpu.dot_dimension_numbers<[1], [0], [0], [1], [0, 0, 1, 1], [], []>} : vector<2x32xf32>, vector<32x128xf32>, vector<2x128xf32> -> vector<2x128xf32>
    %141 = arith.addf %139, %140 : vector<2x128xf32>
    %cst_44 = arith.constant 5.000000e-01 : f32
    %142 = vector.broadcast %cst_44 : f32 to vector<2x128xf32>
    %143 = arith.mulf %142, %141 : vector<2x128xf32>
    %144 = math.tanh %143 : vector<2x128xf32>
    %cst_45 = arith.constant 5.000000e-01 : f32
    %145 = vector.broadcast %cst_45 : f32 to vector<2x128xf32>
    %146 = arith.mulf %145, %144 : vector<2x128xf32>
    %cst_46 = arith.constant 5.000000e-01 : f32
    %147 = vector.broadcast %cst_46 : f32 to vector<2x128xf32>
    %148 = arith.addf %146, %147 : vector<2x128xf32>
    %149 = math.tanh %141 : vector<2x128xf32>
    %150 = vector.extract_strided_slice %148 {offsets = [0, 0], sizes = [2, 32], strides = [1, 1]} : vector<2x128xf32> to vector<2x32xf32>
    %151 = vector.extract_strided_slice %148 {offsets = [0, 32], sizes = [2, 32], strides = [1, 1]} : vector<2x128xf32> to vector<2x32xf32>
    %152 = vector.extract_strided_slice %149 {offsets = [0, 64], sizes = [2, 32], strides = [1, 1]} : vector<2x128xf32> to vector<2x32xf32>
    %153 = vector.extract_strided_slice %148 {offsets = [0, 96], sizes = [2, 32], strides = [1, 1]} : vector<2x128xf32> to vector<2x32xf32>
    %154 = arith.mulf %151, %114 : vector<2x32xf32>
    %155 = arith.mulf %150, %152 : vector<2x32xf32>
    %156 = arith.addf %154, %155 : vector<2x32xf32>
    %157 = math.tanh %156 : vector<2x32xf32>
    %158 = arith.mulf %153, %157 : vector<2x32xf32>
    %159 = tpu.concatenate %158, %137 in 1 : vector<2x32xf32>, vector<2x32xf32> -> vector<2x64xf32>
    %cst_47 = arith.constant dense<0.000000e+00> : vector<2x128xf32>
    %160 = tpu.matmul %159, %3, %cst_47 {dimension_numbers = #tpu.dot_dimension_numbers<[1], [0], [0], [1], [0, 0, 1, 1], [], []>} : vector<2x64xf32>, vector<64x128xf32>, vector<2x128xf32> -> vector<2x128xf32>
    %161 = vector.broadcast %4 : vector<1x128xf32> to vector<2x128xf32>
    %162 = arith.addf %160, %161 : vector<2x128xf32>
    %cst_48 = arith.constant 5.000000e-01 : f32
    %163 = vector.broadcast %cst_48 : f32 to vector<2x128xf32>
    %164 = arith.mulf %163, %162 : vector<2x128xf32>
    %165 = math.tanh %164 : vector<2x128xf32>
    %cst_49 = arith.constant 5.000000e-01 : f32
    %166 = vector.broadcast %cst_49 : f32 to vector<2x128xf32>
    %167 = arith.mulf %166, %165 : vector<2x128xf32>
    %cst_50 = arith.constant 5.000000e-01 : f32
    %168 = vector.broadcast %cst_50 : f32 to vector<2x128xf32>
    %169 = arith.addf %167, %168 : vector<2x128xf32>
    %170 = math.tanh %162 : vector<2x128xf32>
    %171 = vector.extract_strided_slice %169 {offsets = [0, 0], sizes = [2, 32], strides = [1, 1]} : vector<2x128xf32> to vector<2x32xf32>
    %172 = vector.extract_strided_slice %169 {offsets = [0, 32], sizes = [2, 32], strides = [1, 1]} : vector<2x128xf32> to vector<2x32xf32>
    %173 = vector.extract_strided_slice %170 {offsets = [0, 64], sizes = [2, 32], strides = [1, 1]} : vector<2x128xf32> to vector<2x32xf32>
    %174 = vector.extract_strided_slice %169 {offsets = [0, 96], sizes = [2, 32], strides = [1, 1]} : vector<2x128xf32> to vector<2x32xf32>
    %175 = arith.mulf %172, %135 : vector<2x32xf32>
    %176 = arith.mulf %171, %173 : vector<2x32xf32>
    %177 = arith.addf %175, %176 : vector<2x32xf32>
    %178 = math.tanh %177 : vector<2x32xf32>
    %179 = arith.mulf %174, %178 : vector<2x32xf32>
    %c6 = arith.constant 6 : index
    %c0_51 = arith.constant 0 : index
    %180 = vector.load %arg10[%c6, %c0_51] : memref<16x32xf32, #tpu.memory_space<vmem>>, vector<2x32xf32>
    tpu.vector_store %arg10[%c6, %c0_51], %179 {strides = array<i32>} : memref<16x32xf32, #tpu.memory_space<vmem>>, vector<2x32xf32>,
    %181 = vector.extract_strided_slice %8 {offsets = [8, 0], sizes = [2, 128], strides = [1, 1]} : vector<16x128xf32> to vector<2x128xf32>
    %cst_52 = arith.constant dense<0.000000e+00> : vector<2x128xf32>
    %182 = tpu.matmul %158, %1, %cst_52 {dimension_numbers = #tpu.dot_dimension_numbers<[1], [0], [0], [1], [0, 0, 1, 1], [], []>} : vector<2x32xf32>, vector<32x128xf32>, vector<2x128xf32> -> vector<2x128xf32>
    %183 = arith.addf %181, %182 : vector<2x128xf32>
    %cst_53 = arith.constant 5.000000e-01 : f32
    %184 = vector.broadcast %cst_53 : f32 to vector<2x128xf32>
    %185 = arith.mulf %184, %183 : vector<2x128xf32>
    %186 = math.tanh %185 : vector<2x128xf32>
    %cst_54 = arith.constant 5.000000e-01 : f32
    %187 = vector.broadcast %cst_54 : f32 to vector<2x128xf32>
    %188 = arith.mulf %187, %186 : vector<2x128xf32>
    %cst_55 = arith.constant 5.000000e-01 : f32
    %189 = vector.broadcast %cst_55 : f32 to vector<2x128xf32>
    %190 = arith.addf %188, %189 : vector<2x128xf32>
    %191 = math.tanh %183 : vector<2x128xf32>
    %192 = vector.extract_strided_slice %190 {offsets = [0, 0], sizes = [2, 32], strides = [1, 1]} : vector<2x128xf32> to vector<2x32xf32>
    %193 = vector.extract_strided_slice %190 {offsets = [0, 32], sizes = [2, 32], strides = [1, 1]} : vector<2x128xf32> to vector<2x32xf32>
    %194 = vector.extract_strided_slice %191 {offsets = [0, 64], sizes = [2, 32], strides = [1, 1]} : vector<2x128xf32> to vector<2x32xf32>
    %195 = vector.extract_strided_slice %190 {offsets = [0, 96], sizes = [2, 32], strides = [1, 1]} : vector<2x128xf32> to vector<2x32xf32>
    %196 = arith.mulf %193, %156 : vector<2x32xf32>
    %197 = arith.mulf %192, %194 : vector<2x32xf32>
    %198 = arith.addf %196, %197 : vector<2x32xf32>
    %199 = math.tanh %198 : vector<2x32xf32>
    %200 = arith.mulf %195, %199 : vector<2x32xf32>
    %201 = tpu.concatenate %200, %179 in 1 : vector<2x32xf32>, vector<2x32xf32> -> vector<2x64xf32>
    %cst_56 = arith.constant dense<0.000000e+00> : vector<2x128xf32>
    %202 = tpu.matmul %201, %3, %cst_56 {dimension_numbers = #tpu.dot_dimension_numbers<[1], [0], [0], [1], [0, 0, 1, 1], [], []>} : vector<2x64xf32>, vector<64x128xf32>, vector<2x128xf32> -> vector<2x128xf32>
    %203 = vector.broadcast %4 : vector<1x128xf32> to vector<2x128xf32>
    %204 = arith.addf %202, %203 : vector<2x128xf32>
    %cst_57 = arith.constant 5.000000e-01 : f32
    %205 = vector.broadcast %cst_57 : f32 to vector<2x128xf32>
    %206 = arith.mulf %205, %204 : vector<2x128xf32>
    %207 = math.tanh %206 : vector<2x128xf32>
    %cst_58 = arith.constant 5.000000e-01 : f32
    %208 = vector.broadcast %cst_58 : f32 to vector<2x128xf32>
    %209 = arith.mulf %208, %207 : vector<2x128xf32>
    %cst_59 = arith.constant 5.000000e-01 : f32
    %210 = vector.broadcast %cst_59 : f32 to vector<2x128xf32>
    %211 = arith.addf %209, %210 : vector<2x128xf32>
    %212 = math.tanh %204 : vector<2x128xf32>
    %213 = vector.extract_strided_slice %211 {offsets = [0, 0], sizes = [2, 32], strides = [1, 1]} : vector<2x128xf32> to vector<2x32xf32>
    %214 = vector.extract_strided_slice %211 {offsets = [0, 32], sizes = [2, 32], strides = [1, 1]} : vector<2x128xf32> to vector<2x32xf32>
    %215 = vector.extract_strided_slice %212 {offsets = [0, 64], sizes = [2, 32], strides = [1, 1]} : vector<2x128xf32> to vector<2x32xf32>
    %216 = vector.extract_strided_slice %211 {offsets = [0, 96], sizes = [2, 32], strides = [1, 1]} : vector<2x128xf32> to vector<2x32xf32>
    %217 = arith.mulf %214, %177 : vector<2x32xf32>
    %218 = arith.mulf %213, %215 : vector<2x32xf32>
    %219 = arith.addf %217, %218 : vector<2x32xf32>
    %220 = math.tanh %219 : vector<2x32xf32>
    %221 = arith.mulf %216, %220 : vector<2x32xf32>
    %c8 = arith.constant 8 : index
    %c0_60 = arith.constant 0 : index
    %222 = vector.load %arg10[%c8, %c0_60] : memref<16x32xf32, #tpu.memory_space<vmem>>, vector<2x32xf32>
    tpu.vector_store %arg10[%c8, %c0_60], %221 {strides = array<i32>} : memref<16x32xf32, #tpu.memory_space<vmem>>, vector<2x32xf32>,
    %223 = vector.extract_strided_slice %8 {offsets = [10, 0], sizes = [2, 128], strides = [1, 1]} : vector<16x128xf32> to vector<2x128xf32>
    %cst_61 = arith.constant dense<0.000000e+00> : vector<2x128xf32>
    %224 = tpu.matmul %200, %1, %cst_61 {dimension_numbers = #tpu.dot_dimension_numbers<[1], [0], [0], [1], [0, 0, 1, 1], [], []>} : vector<2x32xf32>, vector<32x128xf32>, vector<2x128xf32> -> vector<2x128xf32>
    %225 = arith.addf %223, %224 : vector<2x128xf32>
    %cst_62 = arith.constant 5.000000e-01 : f32
    %226 = vector.broadcast %cst_62 : f32 to vector<2x128xf32>
    %227 = arith.mulf %226, %225 : vector<2x128xf32>
    %228 = math.tanh %227 : vector<2x128xf32>
    %cst_63 = arith.constant 5.000000e-01 : f32
    %229 = vector.broadcast %cst_63 : f32 to vector<2x128xf32>
    %230 = arith.mulf %229, %228 : vector<2x128xf32>
    %cst_64 = arith.constant 5.000000e-01 : f32
    %231 = vector.broadcast %cst_64 : f32 to vector<2x128xf32>
    %232 = arith.addf %230, %231 : vector<2x128xf32>
    %233 = math.tanh %225 : vector<2x128xf32>
    %234 = vector.extract_strided_slice %232 {offsets = [0, 0], sizes = [2, 32], strides = [1, 1]} : vector<2x128xf32> to vector<2x32xf32>
    %235 = vector.extract_strided_slice %232 {offsets = [0, 32], sizes = [2, 32], strides = [1, 1]} : vector<2x128xf32> to vector<2x32xf32>
    %236 = vector.extract_strided_slice %233 {offsets = [0, 64], sizes = [2, 32], strides = [1, 1]} : vector<2x128xf32> to vector<2x32xf32>
    %237 = vector.extract_strided_slice %232 {offsets = [0, 96], sizes = [2, 32], strides = [1, 1]} : vector<2x128xf32> to vector<2x32xf32>
    %238 = arith.mulf %235, %198 : vector<2x32xf32>
    %239 = arith.mulf %234, %236 : vector<2x32xf32>
    %240 = arith.addf %238, %239 : vector<2x32xf32>
    %241 = math.tanh %240 : vector<2x32xf32>
    %242 = arith.mulf %237, %241 : vector<2x32xf32>
    %243 = tpu.concatenate %242, %221 in 1 : vector<2x32xf32>, vector<2x32xf32> -> vector<2x64xf32>
    %cst_65 = arith.constant dense<0.000000e+00> : vector<2x128xf32>
    %244 = tpu.matmul %243, %3, %cst_65 {dimension_numbers = #tpu.dot_dimension_numbers<[1], [0], [0], [1], [0, 0, 1, 1], [], []>} : vector<2x64xf32>, vector<64x128xf32>, vector<2x128xf32> -> vector<2x128xf32>
    %245 = vector.broadcast %4 : vector<1x128xf32> to vector<2x128xf32>
    %246 = arith.addf %244, %245 : vector<2x128xf32>
    %cst_66 = arith.constant 5.000000e-01 : f32
    %247 = vector.broadcast %cst_66 : f32 to vector<2x128xf32>
    %248 = arith.mulf %247, %246 : vector<2x128xf32>
    %249 = math.tanh %248 : vector<2x128xf32>
    %cst_67 = arith.constant 5.000000e-01 : f32
    %250 = vector.broadcast %cst_67 : f32 to vector<2x128xf32>
    %251 = arith.mulf %250, %249 : vector<2x128xf32>
    %cst_68 = arith.constant 5.000000e-01 : f32
    %252 = vector.broadcast %cst_68 : f32 to vector<2x128xf32>
    %253 = arith.addf %251, %252 : vector<2x128xf32>
    %254 = math.tanh %246 : vector<2x128xf32>
    %255 = vector.extract_strided_slice %253 {offsets = [0, 0], sizes = [2, 32], strides = [1, 1]} : vector<2x128xf32> to vector<2x32xf32>
    %256 = vector.extract_strided_slice %253 {offsets = [0, 32], sizes = [2, 32], strides = [1, 1]} : vector<2x128xf32> to vector<2x32xf32>
    %257 = vector.extract_strided_slice %254 {offsets = [0, 64], sizes = [2, 32], strides = [1, 1]} : vector<2x128xf32> to vector<2x32xf32>
    %258 = vector.extract_strided_slice %253 {offsets = [0, 96], sizes = [2, 32], strides = [1, 1]} : vector<2x128xf32> to vector<2x32xf32>
    %259 = arith.mulf %256, %219 : vector<2x32xf32>
    %260 = arith.mulf %255, %257 : vector<2x32xf32>
    %261 = arith.addf %259, %260 : vector<2x32xf32>
    %262 = math.tanh %261 : vector<2x32xf32>
    %263 = arith.mulf %258, %262 : vector<2x32xf32>
    %c10 = arith.constant 10 : index
    %c0_69 = arith.constant 0 : index
    %264 = vector.load %arg10[%c10, %c0_69] : memref<16x32xf32, #tpu.memory_space<vmem>>, vector<2x32xf32>
    tpu.vector_store %arg10[%c10, %c0_69], %263 {strides = array<i32>} : memref<16x32xf32, #tpu.memory_space<vmem>>, vector<2x32xf32>,
    %265 = vector.extract_strided_slice %8 {offsets = [12, 0], sizes = [2, 128], strides = [1, 1]} : vector<16x128xf32> to vector<2x128xf32>
    %cst_70 = arith.constant dense<0.000000e+00> : vector<2x128xf32>
    %266 = tpu.matmul %242, %1, %cst_70 {dimension_numbers = #tpu.dot_dimension_numbers<[1], [0], [0], [1], [0, 0, 1, 1], [], []>} : vector<2x32xf32>, vector<32x128xf32>, vector<2x128xf32> -> vector<2x128xf32>
    %267 = arith.addf %265, %266 : vector<2x128xf32>
    %cst_71 = arith.constant 5.000000e-01 : f32
    %268 = vector.broadcast %cst_71 : f32 to vector<2x128xf32>
    %269 = arith.mulf %268, %267 : vector<2x128xf32>
    %270 = math.tanh %269 : vector<2x128xf32>
    %cst_72 = arith.constant 5.000000e-01 : f32
    %271 = vector.broadcast %cst_72 : f32 to vector<2x128xf32>
    %272 = arith.mulf %271, %270 : vector<2x128xf32>
    %cst_73 = arith.constant 5.000000e-01 : f32
    %273 = vector.broadcast %cst_73 : f32 to vector<2x128xf32>
    %274 = arith.addf %272, %273 : vector<2x128xf32>
    %275 = math.tanh %267 : vector<2x128xf32>
    %276 = vector.extract_strided_slice %274 {offsets = [0, 0], sizes = [2, 32], strides = [1, 1]} : vector<2x128xf32> to vector<2x32xf32>
    %277 = vector.extract_strided_slice %274 {offsets = [0, 32], sizes = [2, 32], strides = [1, 1]} : vector<2x128xf32> to vector<2x32xf32>
    %278 = vector.extract_strided_slice %275 {offsets = [0, 64], sizes = [2, 32], strides = [1, 1]} : vector<2x128xf32> to vector<2x32xf32>
    %279 = vector.extract_strided_slice %274 {offsets = [0, 96], sizes = [2, 32], strides = [1, 1]} : vector<2x128xf32> to vector<2x32xf32>
    %280 = arith.mulf %277, %240 : vector<2x32xf32>
    %281 = arith.mulf %276, %278 : vector<2x32xf32>
    %282 = arith.addf %280, %281 : vector<2x32xf32>
    %283 = math.tanh %282 : vector<2x32xf32>
    %284 = arith.mulf %279, %283 : vector<2x32xf32>
    %285 = tpu.concatenate %284, %263 in 1 : vector<2x32xf32>, vector<2x32xf32> -> vector<2x64xf32>
    %cst_74 = arith.constant dense<0.000000e+00> : vector<2x128xf32>
    %286 = tpu.matmul %285, %3, %cst_74 {dimension_numbers = #tpu.dot_dimension_numbers<[1], [0], [0], [1], [0, 0, 1, 1], [], []>} : vector<2x64xf32>, vector<64x128xf32>, vector<2x128xf32> -> vector<2x128xf32>
    %287 = vector.broadcast %4 : vector<1x128xf32> to vector<2x128xf32>
    %288 = arith.addf %286, %287 : vector<2x128xf32>
    %cst_75 = arith.constant 5.000000e-01 : f32
    %289 = vector.broadcast %cst_75 : f32 to vector<2x128xf32>
    %290 = arith.mulf %289, %288 : vector<2x128xf32>
    %291 = math.tanh %290 : vector<2x128xf32>
    %cst_76 = arith.constant 5.000000e-01 : f32
    %292 = vector.broadcast %cst_76 : f32 to vector<2x128xf32>
    %293 = arith.mulf %292, %291 : vector<2x128xf32>
    %cst_77 = arith.constant 5.000000e-01 : f32
    %294 = vector.broadcast %cst_77 : f32 to vector<2x128xf32>
    %295 = arith.addf %293, %294 : vector<2x128xf32>
    %296 = math.tanh %288 : vector<2x128xf32>
    %297 = vector.extract_strided_slice %295 {offsets = [0, 0], sizes = [2, 32], strides = [1, 1]} : vector<2x128xf32> to vector<2x32xf32>
    %298 = vector.extract_strided_slice %295 {offsets = [0, 32], sizes = [2, 32], strides = [1, 1]} : vector<2x128xf32> to vector<2x32xf32>
    %299 = vector.extract_strided_slice %296 {offsets = [0, 64], sizes = [2, 32], strides = [1, 1]} : vector<2x128xf32> to vector<2x32xf32>
    %300 = vector.extract_strided_slice %295 {offsets = [0, 96], sizes = [2, 32], strides = [1, 1]} : vector<2x128xf32> to vector<2x32xf32>
    %301 = arith.mulf %298, %261 : vector<2x32xf32>
    %302 = arith.mulf %297, %299 : vector<2x32xf32>
    %303 = arith.addf %301, %302 : vector<2x32xf32>
    %304 = math.tanh %303 : vector<2x32xf32>
    %305 = arith.mulf %300, %304 : vector<2x32xf32>
    %c12 = arith.constant 12 : index
    %c0_78 = arith.constant 0 : index
    %306 = vector.load %arg10[%c12, %c0_78] : memref<16x32xf32, #tpu.memory_space<vmem>>, vector<2x32xf32>
    tpu.vector_store %arg10[%c12, %c0_78], %305 {strides = array<i32>} : memref<16x32xf32, #tpu.memory_space<vmem>>, vector<2x32xf32>,
    %307 = vector.extract_strided_slice %8 {offsets = [14, 0], sizes = [2, 128], strides = [1, 1]} : vector<16x128xf32> to vector<2x128xf32>
    %cst_79 = arith.constant dense<0.000000e+00> : vector<2x128xf32>
    %308 = tpu.matmul %284, %1, %cst_79 {dimension_numbers = #tpu.dot_dimension_numbers<[1], [0], [0], [1], [0, 0, 1, 1], [], []>} : vector<2x32xf32>, vector<32x128xf32>, vector<2x128xf32> -> vector<2x128xf32>
    %309 = arith.addf %307, %308 : vector<2x128xf32>
    %cst_80 = arith.constant 5.000000e-01 : f32
    %310 = vector.broadcast %cst_80 : f32 to vector<2x128xf32>
    %311 = arith.mulf %310, %309 : vector<2x128xf32>
    %312 = math.tanh %311 : vector<2x128xf32>
    %cst_81 = arith.constant 5.000000e-01 : f32
    %313 = vector.broadcast %cst_81 : f32 to vector<2x128xf32>
    %314 = arith.mulf %313, %312 : vector<2x128xf32>
    %cst_82 = arith.constant 5.000000e-01 : f32
    %315 = vector.broadcast %cst_82 : f32 to vector<2x128xf32>
    %316 = arith.addf %314, %315 : vector<2x128xf32>
    %317 = math.tanh %309 : vector<2x128xf32>
    %318 = vector.extract_strided_slice %316 {offsets = [0, 0], sizes = [2, 32], strides = [1, 1]} : vector<2x128xf32> to vector<2x32xf32>
    %319 = vector.extract_strided_slice %316 {offsets = [0, 32], sizes = [2, 32], strides = [1, 1]} : vector<2x128xf32> to vector<2x32xf32>
    %320 = vector.extract_strided_slice %317 {offsets = [0, 64], sizes = [2, 32], strides = [1, 1]} : vector<2x128xf32> to vector<2x32xf32>
    %321 = vector.extract_strided_slice %316 {offsets = [0, 96], sizes = [2, 32], strides = [1, 1]} : vector<2x128xf32> to vector<2x32xf32>
    %322 = arith.mulf %319, %282 : vector<2x32xf32>
    %323 = arith.mulf %318, %320 : vector<2x32xf32>
    %324 = arith.addf %322, %323 : vector<2x32xf32>
    %325 = math.tanh %324 : vector<2x32xf32>
    %326 = arith.mulf %321, %325 : vector<2x32xf32>
    %327 = tpu.concatenate %326, %305 in 1 : vector<2x32xf32>, vector<2x32xf32> -> vector<2x64xf32>
    %cst_83 = arith.constant dense<0.000000e+00> : vector<2x128xf32>
    %328 = tpu.matmul %327, %3, %cst_83 {dimension_numbers = #tpu.dot_dimension_numbers<[1], [0], [0], [1], [0, 0, 1, 1], [], []>} : vector<2x64xf32>, vector<64x128xf32>, vector<2x128xf32> -> vector<2x128xf32>
    %329 = vector.broadcast %4 : vector<1x128xf32> to vector<2x128xf32>
    %330 = arith.addf %328, %329 : vector<2x128xf32>
    %cst_84 = arith.constant 5.000000e-01 : f32
    %331 = vector.broadcast %cst_84 : f32 to vector<2x128xf32>
    %332 = arith.mulf %331, %330 : vector<2x128xf32>
    %333 = math.tanh %332 : vector<2x128xf32>
    %cst_85 = arith.constant 5.000000e-01 : f32
    %334 = vector.broadcast %cst_85 : f32 to vector<2x128xf32>
    %335 = arith.mulf %334, %333 : vector<2x128xf32>
    %cst_86 = arith.constant 5.000000e-01 : f32
    %336 = vector.broadcast %cst_86 : f32 to vector<2x128xf32>
    %337 = arith.addf %335, %336 : vector<2x128xf32>
    %338 = math.tanh %330 : vector<2x128xf32>
    %339 = vector.extract_strided_slice %337 {offsets = [0, 0], sizes = [2, 32], strides = [1, 1]} : vector<2x128xf32> to vector<2x32xf32>
    %340 = vector.extract_strided_slice %337 {offsets = [0, 32], sizes = [2, 32], strides = [1, 1]} : vector<2x128xf32> to vector<2x32xf32>
    %341 = vector.extract_strided_slice %338 {offsets = [0, 64], sizes = [2, 32], strides = [1, 1]} : vector<2x128xf32> to vector<2x32xf32>
    %342 = vector.extract_strided_slice %337 {offsets = [0, 96], sizes = [2, 32], strides = [1, 1]} : vector<2x128xf32> to vector<2x32xf32>
    %343 = arith.mulf %340, %303 : vector<2x32xf32>
    %344 = arith.mulf %339, %341 : vector<2x32xf32>
    %345 = arith.addf %343, %344 : vector<2x32xf32>
    %346 = math.tanh %345 : vector<2x32xf32>
    %347 = arith.mulf %342, %346 : vector<2x32xf32>
    %c14 = arith.constant 14 : index
    %c0_87 = arith.constant 0 : index
    %348 = vector.load %arg10[%c14, %c0_87] : memref<16x32xf32, #tpu.memory_space<vmem>>, vector<2x32xf32>
    tpu.vector_store %arg10[%c14, %c0_87], %347 {strides = array<i32>} : memref<16x32xf32, #tpu.memory_space<vmem>>, vector<2x32xf32>,
    %c0_88 = arith.constant 0 : index
    %c0_89 = arith.constant 0 : index
    %349 = vector.load %arg10[%c0_88, %c0_89] : memref<16x32xf32, #tpu.memory_space<vmem>>, vector<16x32xf32>
    %c0_90 = arith.constant 0 : index
    %c0_91 = arith.constant 0 : index
    %350 = vector.load %arg7[%c0_90, %c0_91] : memref<32x128xf32, #tpu.memory_space<vmem>>, vector<32x128xf32>
    %cst_92 = arith.constant dense<0.000000e+00> : vector<16x128xf32>
    %351 = tpu.matmul %349, %350, %cst_92 {dimension_numbers = #tpu.dot_dimension_numbers<[1], [0], [0], [1], [0, 0, 1, 1], [], []>} : vector<16x32xf32>, vector<32x128xf32>, vector<16x128xf32> -> vector<16x128xf32>
    %c0_93 = arith.constant 0 : index
    %c0_94 = arith.constant 0 : index
    %352 = vector.load %arg8[%c0_93, %c0_94] : memref<1x128xf32, #tpu.memory_space<vmem>>, vector<1x128xf32>
    %353 = vector.broadcast %352 : vector<1x128xf32> to vector<16x128xf32>
    %354 = arith.addf %351, %353 : vector<16x128xf32>
    %c0_95 = arith.constant 0 : index
    %c0_96 = arith.constant 0 : index
    %355 = vector.load %arg9[%c0_95, %c0_96] : memref<16x128xf32, #tpu.memory_space<vmem>>, vector<16x128xf32>
    tpu.vector_store %arg9[%c0_95, %c0_96], %354 {strides = array<i32>} : memref<16x128xf32, #tpu.memory_space<vmem>>, vector<16x128xf32>,
    return
  }
  func.func @transform_0(%arg0: i32) -> (i32, i32) {
    %c0_i32 = arith.constant 0 : i32
    %c0_i32_0 = arith.constant 0 : i32
    %c0_i32_1 = arith.constant 0 : i32
    return %c0_i32, %c0_i32_0 : i32, i32
  }
  func.func @transform_1(%arg0: i32) -> (i32, i32) {
    %c0_i32 = arith.constant 0 : i32
    %c0_i32_0 = arith.constant 0 : i32
    %c0_i32_1 = arith.constant 0 : i32
    return %c0_i32, %c0_i32_0 : i32, i32
  }
  func.func @transform_2(%arg0: i32) -> (i32, i32) {
    %c0_i32 = arith.constant 0 : i32
    %c0_i32_0 = arith.constant 0 : i32
    %c0_i32_1 = arith.constant 0 : i32
    return %c0_i32, %c0_i32_0 : i32, i32
  }
  func.func @transform_3(%arg0: i32) -> (i32, i32) {
    %c0_i32 = arith.constant 0 : i32
    %c0_i32_0 = arith.constant 0 : i32
    %c0_i32_1 = arith.constant 0 : i32
    return %c0_i32, %c0_i32_0 : i32, i32
  }
  func.func @transform_4(%arg0: i32) -> (i32, i32) {
    %c0_i32 = arith.constant 0 : i32
    %c0_i32_0 = arith.constant 0 : i32
    %c0_i32_1 = arith.constant 0 : i32
    return %c0_i32, %c0_i32_0 : i32, i32
  }
  func.func @transform_5(%arg0: i32) -> (i32, i32) {
    %c0_i32 = arith.constant 0 : i32
    %c0_i32_0 = arith.constant 0 : i32
    %c0_i32_1 = arith.constant 0 : i32
    return %c0_i32, %c0_i32_0 : i32, i32
  }
  func.func @transform_6(%arg0: i32) -> (i32, i32) {
    %c0_i32 = arith.constant 0 : i32
    %c0_i32_0 = arith.constant 0 : i32
    %c0_i32_1 = arith.constant 0 : i32
    return %c0_i32, %c0_i32_0 : i32, i32
  }
  func.func @transform_7(%arg0: i32) -> (i32, i32) {
    %c0_i32 = arith.constant 0 : i32
    %c0_i32_0 = arith.constant 0 : i32
    %c0_i32_1 = arith.constant 0 : i32
    return %c0_i32, %c0_i32_0 : i32, i32
  }
  func.func @transform_8(%arg0: i32) -> (i32, i32) {
    %c0_i32 = arith.constant 0 : i32
    %c0_i32_0 = arith.constant 0 : i32
    %c0_i32_1 = arith.constant 0 : i32
    return %c0_i32, %c0_i32_0 : i32, i32
  }
}

</mosaic_0001>

<bundles_post_ra>
// kernel: lstm_reg_forward.1
= control target key start
LH: loop header
LB: loop body
LE: loop exit
PB: predicated region body
PF: predicated region fallthrough
CT: control target
= control target key end

     0   :  { %vm52_vm0 = vcmask 64512   ;;  %v2583_v0 = vmov 0.0|0.0   ;;  %vm2584_vm1 = vmmov 0   ;;  %v2585_v4 = vmov 0.0   ;;  %s2586_s18 = smov 64   ;;  %s3055_s2 = inlined_call_operand.vmem [shape: f32[32,128], index: 2, kind: input, shape index: {}]   ;;  %s3056_s1 = inlined_call_operand.vmem [shape: f32[8,128], index: 1, kind: input, shape index: {}]   ;;  %s3057_s0 = inlined_call_operand.vmem [shape: f32[16,8], index: 0, kind: input, shape index: {}]   ;;  %s3058_s3 = inlined_call_operand.vmem [shape: f32[1,128], index: 3, kind: input, shape index: {}]   ;;  %s3059_s4 = inlined_call_operand.vmem [shape: f32[64,128], index: 4, kind: input, shape index: {}]   ;;  %s3060_s5 = inlined_call_operand.vmem [shape: f32[1,128], index: 5, kind: input, shape index: {}]   ;;  %s3061_s6 = inlined_call_operand.vmem [shape: f32[32,128], index: 6, kind: input, shape index: {}]   ;;  %s3062_s7 = inlined_call_operand.vmem [shape: f32[1,128], index: 7, kind: input, shape index: {}]   ;;  %s3063_s8 = inlined_call_operand.vmem [shape: f32[16,128], index: 8, kind: output, shape index: {}]  }
   0x1   :  { %2330 = vmatprep.subr.bf16.mxu1 %v2583_v0  ;;  %v30_v1 = vld [vmem:[%s3055_s2] sm:$0xff]  ;;  %v31_v2 = vld [vmem:[%s3055_s2 + $0x8] sm:$0xff]  ;;  %2087 = vmatprep.mubr.msk.f32.mxu1 %vm2584_vm1, %v2585_v4  ;;  %v32_v8 = vld [vmem:[%s3055_s2 + $0x10] sm:$0xff]  ;;  %vm134_vm2 = vcmask 261120   ;;  %vm242_vm3 = vcmask 523264   ;;  %vm342_vm4 = vcmask 254976  }
   0x2   :  { %v29_v3 = vld [vmem:[%s3056_s1] sm:$0xff]  ;;  %v2645_v5 = vpack.c.bf16 %v31_v2, %v30_v1  ;;  %v45_v7 = vld [vmem:[%s3057_s0 + $0x8] sm:$0xff]  ;;  %v33_v9 = vld [vmem:[%s3055_s2 + $0x18] sm:$0xff] }
   0x3   :  { %2074 = vmatprep.subr.mxu0 %v29_v3  ;;  %v44_v6 = vld [vmem:[%s3057_s0] sm:$0xff]  ;;  %v2662_v10 = vpack.c.bf16 %v33_v9, %v32_v8  ;;  %v36_v30 = vld [vmem:[%s3059_s4 + $0x8] sm:$0xff]  ;;  %v37_v31 = vld [vmem:[%s3059_s4 + $0x10] sm:$0xff] }
   0x4   :  { %2075 = vmatpush3.msra.mxu0 %v29_v3  ;;  %2076 = vmatprep.mubr.msk.f32.mxu0 %vm52_vm0, %v44_v6  ;;  %v1931_v11 = vld [vmem:[%s3058_s3] ss:$0 sm:$0xff]  ;;  %s2587_s3 = smov 32   ;;  %v38_v33 = vld [vmem:[%s3059_s4 + $0x18] sm:$0xff]  ;;  %v40_v36 = vld [vmem:[%s3059_s4 + $0x28] sm:$0xff] }
   0x5   :  { %2332 = vmatpush3.bf16.msra.mxu1 %v2645_v5  ;;  %2077 = vmatmul.mubr.msk.f32.vlgmr.msra.gmra.mrb[0].mxu0 %vm52_vm0, %v45_v7  ;;  %v35_v29 = vld [vmem:[%s3059_s4] sm:$0xff]  ;;  %v2705_v34 = vpack.c.bf16 %v38_v33, %v37_v31  ;;  %v41_v38 = vld [vmem:[%s3059_s4 + $0x30] sm:$0xff]  ;;  %v42_v39 = vld [vmem:[%s3059_s4 + $0x38] sm:$0xff] }
   0x6   :  { %2333 = vmatprep.subr.bf16.mxu1 %v2583_v0  ;;  %2336 = vmatprep.subr.bf16.mxu0 %v2583_v0  ;;  %v2699_v32 = vpack.c.bf16 %v36_v30, %v35_v29  ;;  %v39_v35 = vld [vmem:[%s3059_s4 + $0x20] sm:$0xff]  ;;  %v2726_v41 = vpack.c.bf16 %v42_v39, %v41_v38 }
   0x7   :  { %2106 = vmatprep.mubr.msk.f32.mxu0 %vm2584_vm1, %v2585_v4  ;;  %v2715_v37 = vpack.c.bf16 %v40_v36, %v39_v35  ;;  %v2754_v46 = vld [vmem:[%s3060_s5] ss:$0 sm:$0xff] }
   0x8   :  { %2338 = vmatpush3.bf16.msra.mxu0 %v2699_v32 }
   0x9   :  { %2335 = vmatpush3.bf16.msra.mxu1 %v2662_v10  ;;  %2339 = vmatprep.subr.bf16.mxu0 %v2583_v0 }
   0xa   :  { %2348 = vmatprep.subr.bf16.mxu1 %v2583_v0 }
   0xc   :  { %2088 = vmatmul.mubr.f32.vlgmr.msra.gmra.mrb[0].mxu1 %v2585_v4  ;;  %2341 = vmatpush3.bf16.msra.mxu0 %v2705_v34 }
   0xd   :  { %2350 = vmatpush3.bf16.msra.mxu1 %v2645_v5  ;;  %2117 = vmatprep.mubr.msk.f32.mxu1 %vm2584_vm1, %v2585_v4 }
   0xe   :  { %2351 = vmatprep.subr.bf16.mxu1 %v2583_v0  ;;  %2342 = vmatprep.subr.bf16.mxu0 %v2583_v0 }
  0x10   :  { %2344 = vmatpush3.bf16.msra.mxu0 %v2715_v37 }
  0x11   :  { %2353 = vmatpush3.bf16.msra.mxu1 %v2662_v10  ;;  %2345 = vmatprep.subr.bf16.mxu0 %v2583_v0 }
  0x12   :  { %2354 = vmatprep.subr.bf16.mxu1 %v2583_v0 }
  0x14   :  { %2347 = vmatpush3.bf16.msra.mxu0 %v2726_v41 }
  0x15   :  { %2366 = vmatprep.subr.bf16.mxu0 %v2583_v0 }
  0xd8   :  { %v2078_v12 = vpop.f32.mrb[0].mxu0 }
  0xd9   :  { %v2680_v13 = vadd.f32 %v2078_v12, %v1931_v11  ;;  %v125_v14 = vpop.f32.mrb[1].mxu0 }
  0xda   :  { %v2682_v15 = vadd.f32 %v1931_v11, %v125_v14 }
  0xdf   :  { %v204_v16 = vpop.f32.mrb[0].mxu1 }
  0xe0   :  { %v208_v17 = vadd.f32 %v204_v16, %v2682_v15  ;;  %v2089_v18 = vpop.f32.mrb[1].mxu1 }
  0xe2   :  { %2487 = vtanh.f32 %v208_v17  ;;  %v209_v20 = vmul.f32 0.5, %v208_v17 }
  0xe4   :  { %2489 = vtanh.f32 %v209_v20 }
  0xec   :  { %v2488_v19 = vpop.eup %2487 }
  0xed   :  { %216 = vrot.lane.b32.xlu0 %v2488_v19, %s2586_s18 }
  0xee   :  { %v2490_v21 = vpop.eup %2489 }
  0xef   :  { %v211_v22 = vmul.f32 0.5, %v2490_v21 }
  0xf1   :  { %v212_v23 = vadd.f32 0.5, %v211_v22 }
  0xf3   :  { %v214_v26 = vmul.f32 0.0, %v212_v23 }
 0x15f   :  { %v217_v24 = vpop.permute.xlu0 %216 }
 0x160   :  { %v219_v25 = vmul.f32 %v217_v24, %v212_v23 }
 0x162   :  { %221 = vrot.lane.b32.xlu0 %v219_v25, %s2587_s3 }
 0x1d4   :  { %v222_v27 = vpop.permute.xlu0 %221 }
 0x1d5   :  { %v2687_v28 = vadd.f32 %v222_v27, %v214_v26 }
 0x1d7   :  { %2491 = vtanh.f32 %v2687_v28  ;;  %v426_v7 = vrot.slane %v2687_v28, 6 }
 0x1e1   :  { %v2492_v40 = vpop.eup %2491 }
 0x1e2   :  { %227 = vrot.lane.b32.xlu1 %v2492_v40, %s2586_s18 }
 0x254   :  { %v228_v42 = vpop.permute.xlu1 %227 }
 0x255   :  { %v230_v43 = vmul.f32 %v228_v42, %v212_v23 }
 0x257   :  { %232 = vrot.lane.b32.xlu1 %v230_v43, %s2587_s3 }
 0x2c9   :  { %v233_v44 = vpop.permute.xlu1 %232 }
 0x2ca   :  { %v235_v45 = vsel %vm134_vm2, %v233_v44, 0.0  ;;  %2118 = vmatmul.mubr.msk.f32.vlgmr.msra.gmra.mrb[2].mxu1 %vm134_vm2, %v233_v44 }
 0x2cb   :  { %2107 = vmatmul.mubr.msk.f32.vlgmr.msra.gmra.mrb[2].mxu0 %vm242_vm3, %v235_v45  ;;  %2356 = vmatpush3.bf16.msra.mxu1 %v2699_v32 }
 0x2cc   :  { %2357 = vmatprep.subr.bf16.mxu1 %v2583_v0  ;;  %2368 = vmatpush3.bf16.msra.mxu0 %v2645_v5 }
 0x2cd   :  { %2369 = vmatprep.subr.bf16.mxu0 %v2583_v0  ;;  %2136 = vmatprep.mubr.msk.f32.mxu1 %vm2584_vm1, %v2585_v4 }
 0x2ce   :  { %2147 = vmatprep.mubr.msk.f32.mxu0 %vm2584_vm1, %v2585_v4 }
 0x2cf   :  { %2359 = vmatpush3.bf16.msra.mxu1 %v2705_v34 }
 0x2d0   :  { %2360 = vmatprep.subr.bf16.mxu1 %v2583_v0  ;;  %2371 = vmatpush3.bf16.msra.mxu0 %v2662_v10 }
 0x2d1   :  { %2372 = vmatprep.subr.bf16.mxu0 %v2583_v0 }
 0x2d3   :  { %2362 = vmatpush3.bf16.msra.mxu1 %v2715_v37 }
 0x2d4   :  { %2363 = vmatprep.subr.bf16.mxu1 %v2583_v0 }
 0x2d7   :  { %2365 = vmatpush3.bf16.msra.mxu1 %v2726_v41 }
 0x2d8   :  { %2384 = vmatprep.subr.bf16.mxu1 %v2583_v0 }
 0x39d   :  { %v412_v47 = vpop.f32.mrb[2].mxu1 }
 0x39e   :  { %v417_v48 = vrot.slane %v412_v47, 6  ;;  %v312_v49 = vpop.f32.mrb[2].mxu0  ;;  %v2119_v50 = vpop.f32.mrb[3].mxu1 }
 0x39f   :  { %v313_v51 = vadd.f32 %v2754_v46, %v312_v49  ;;  %v2108_v52 = vpop.f32.mrb[3].mxu0 }
 0x3a0   :  { %v419_v53 = vadd.f32 %v417_v48, %v2682_v15 }
 0x3a1   :  { %2493 = vtanh.f32 %v313_v51  ;;  %v316_v56 = vmul.f32 0.5, %v313_v51 }
 0x3a2   :  { %2495 = vtanh.f32 %v419_v53  ;;  %v420_v57 = vmul.f32 0.5, %v419_v53 }
 0x3a3   :  { %2497 = vtanh.f32 %v316_v56 }
 0x3a4   :  { %2499 = vtanh.f32 %v420_v57 }
 0x3ab   :  { %v2494_v54 = vpop.eup %2493 }
 0x3ac   :  { %v2496_v55 = vpop.eup %2495  ;;  %323 = vrot.lane.b32.xlu0 %v2494_v54, %s2586_s18 }
 0x3ad   :  { %430 = vrot.lane.b32.xlu1 %v2496_v55, %s2586_s18  ;;  %v2498_v58 = vpop.eup %2497 }
 0x3ae   :  { %v2500_v59 = vpop.eup %2499  ;;  %v318_v60 = vmul.f32 0.5, %v2498_v58 }
 0x3af   :  { %v422_v61 = vmul.f32 0.5, %v2500_v59 }
 0x3b0   :  { %v319_v62 = vadd.f32 0.5, %v318_v60 }
 0x3b1   :  { %v423_v1 = vadd.f32 0.5, %v422_v61 }
 0x3b2   :  { %v321_v8 = vmul.f32 0.0, %v319_v62 }
 0x3b3   :  { %v428_v11 = vmul.f32 %v426_v7, %v423_v1 }
 0x41e   :  { %v324_v63 = vpop.permute.xlu0 %323 }
 0x41f   :  { %v326_v2 = vmul.f32 %v324_v63, %v319_v62  ;;  %v431_v3 = vpop.permute.xlu1 %430 }
 0x420   :  { %v433_v6 = vmul.f32 %v431_v3, %v423_v1 }
 0x421   :  { %328 = vrot.lane.b32.xlu0 %v326_v2, %s2587_s3 }
 0x422   :  { %435 = vrot.lane.b32.xlu1 %v433_v6, %s2587_s3 }
 0x493   :  { %v329_v9 = vpop.permute.xlu0 %328 }
 0x494   :  { %v2763_v12 = vadd.f32 %v329_v9, %v321_v8  ;;  %v436_v14 = vpop.permute.xlu1 %435 }
 0x495   :  { %v2765_v16 = vadd.f32 %v436_v14, %v428_v11 }
 0x496   :  { %2501 = vtanh.f32 %v2763_v12 }
 0x497   :  { %2503 = vtanh.f32 %v2765_v16  ;;  %v640_v57 = vrot.slane %v2765_v16, 6 }
 0x4a0   :  { %v2502_v17 = vpop.eup %2501 }
 0x4a1   :  { %v2504_v18 = vpop.eup %2503  ;;  %334 = vrot.lane.b32.xlu0 %v2502_v17, %s2586_s18 }
 0x4a2   :  { %441 = vrot.lane.b32.xlu1 %v2504_v18, %s2586_s18 }
 0x513   :  { %v335_v19 = vpop.permute.xlu0 %334 }
 0x514   :  { %v2771_v20 = vmul.f32 %v335_v19, %v319_v62  ;;  %v442_v21 = vpop.permute.xlu1 %441 }
 0x515   :  { %v444_v22 = vmul.f32 %v442_v21, %v423_v1 }
 0x516   :  { %v449_v23 = vrot.slane %v2771_v20, 6 }
 0x517   :  { %446 = vrot.lane.b32.xlu0 %v444_v22, %s2587_s3  ;;  %v555_v24 = vrot.slane %v444_v22, 2 }
 0x518   :  { %450 = vrot.lane.b32.xlu1 %v449_v23, %s2586_s18 }
 0x51b   :  { %556 = vrot.lane.b32.xlu0 %v555_v24, %s2587_s3 }
 0x589   :  { %v447_v25 = vpop.permute.xlu0 %446 }
 0x58a   :  { %v451_v26 = vpop.permute.xlu1 %450 }
 0x58b   :  { %v453_v27 = vsel %vm134_vm2, %v447_v25, %v451_v26 }
 0x58c   :  { %v455_v28 = vrot.slane %v453_v27, 2 }
 0x58d   :  { %v557_v29 = vpop.permute.xlu0 %556 }
 0x58e   :  { %2137 = vmatmul.mubr.msk.f32.vlgmr.msra.gmra.mrb[4].mxu1 %vm242_vm3, %v455_v28  ;;  %2148 = vmatmul.mubr.msk.f32.vlgmr.msra.gmra.mrb[4].mxu0 %vm134_vm2, %v557_v29 }
 0x58f   :  { %2374 = vmatpush3.bf16.msra.mxu0 %v2699_v32  ;;  %2386 = vmatpush3.bf16.msra.mxu1 %v2645_v5 }
 0x590   :  { %2375 = vmatprep.subr.bf16.mxu0 %v2583_v0  ;;  %2387 = vmatprep.subr.bf16.mxu1 %v2583_v0 }
 0x591   :  { %2166 = vmatprep.mubr.msk.f32.mxu0 %vm2584_vm1, %v2585_v4  ;;  %2177 = vmatprep.mubr.msk.f32.mxu1 %vm2584_vm1, %v2585_v4 }
 0x593   :  { %2377 = vmatpush3.bf16.msra.mxu0 %v2705_v34  ;;  %2389 = vmatpush3.bf16.msra.mxu1 %v2662_v10 }
 0x594   :  { %2378 = vmatprep.subr.bf16.mxu0 %v2583_v0  ;;  %2390 = vmatprep.subr.bf16.mxu1 %v2583_v0 }
 0x597   :  { %2380 = vmatpush3.bf16.msra.mxu0 %v2715_v37 }
 0x598   :  { %2381 = vmatprep.subr.bf16.mxu0 %v2583_v0 }
 0x59b   :  { %2383 = vmatpush3.bf16.msra.mxu0 %v2726_v41 }
 0x59c   :  { %2402 = vmatprep.subr.bf16.mxu0 %v2583_v0 }
 0x661   :  { %v524_v30 = vpop.f32.mrb[4].mxu1  ;;  %v626_v31 = vpop.f32.mrb[4].mxu0 }
 0x662   :  { %v525_v33 = vadd.f32 %v2754_v46, %v524_v30  ;;  %v631_v35 = vrot.slane %v626_v31, 4  ;;  %v2138_v36 = vpop.f32.mrb[5].mxu1  ;;  %v2149_v38 = vpop.f32.mrb[5].mxu0 }
 0x664   :  { %2505 = vtanh.f32 %v525_v33  ;;  %v633_v39 = vadd.f32 %v631_v35, %v2682_v15  ;;  %v528_v43 = vmul.f32 0.5, %v525_v33 }
 0x666   :  { %2507 = vtanh.f32 %v633_v39  ;;  %v634_v44 = vmul.f32 0.5, %v633_v39 }
 0x667   :  { %2509 = vtanh.f32 %v528_v43 }
 0x668   :  { %2511 = vtanh.f32 %v634_v44 }
 0x66e   :  { %v2506_v40 = vpop.eup %2505 }
 0x66f   :  { %535 = vrot.lane.b32.xlu1 %v2506_v40, %s2586_s18 }
 0x670   :  { %v2508_v42 = vpop.eup %2507 }
 0x671   :  { %644 = vrot.lane.b32.xlu0 %v2508_v42, %s2586_s18  ;;  %v2510_v45 = vpop.eup %2509 }
 0x672   :  { %v2512_v47 = vpop.eup %2511  ;;  %v530_v48 = vmul.f32 0.5, %v2510_v45 }
 0x673   :  { %v636_v49 = vmul.f32 0.5, %v2512_v47 }
 0x674   :  { %v531_v50 = vadd.f32 0.5, %v530_v48 }
 0x675   :  { %v637_v53 = vadd.f32 0.5, %v636_v49 }
 0x676   :  { %v533_v56 = vmul.f32 %v531_v50, %v2763_v12 }
 0x677   :  { %v642_v60 = vmul.f32 %v640_v57, %v637_v53 }
 0x6e1   :  { %v536_v51 = vpop.permute.xlu1 %535 }
 0x6e2   :  { %v538_v52 = vmul.f32 %v536_v51, %v531_v50 }
 0x6e3   :  { %v645_v54 = vpop.permute.xlu0 %644 }
 0x6e4   :  { %540 = vrot.lane.b32.xlu1 %v538_v52, %s2587_s3  ;;  %v647_v55 = vmul.f32 %v645_v54, %v637_v53 }
 0x6e6   :  { %649 = vrot.lane.b32.xlu0 %v647_v55, %s2587_s3 }
 0x756   :  { %v541_v58 = vpop.permute.xlu1 %540 }
 0x757   :  { %v2804_v59 = vadd.f32 %v541_v58, %v533_v56 }
 0x758   :  { %v650_v61 = vpop.permute.xlu0 %649 }
 0x759   :  { %2513 = vtanh.f32 %v2804_v59  ;;  %v2807_v62 = vadd.f32 %v650_v61, %v642_v60 }
 0x75b   :  { %2515 = vtanh.f32 %v2807_v62  ;;  %v854_v44 = vrot.slane %v2807_v62, 6 }
 0x763   :  { %v2514_v63 = vpop.eup %2513 }
 0x764   :  { %546 = vrot.lane.b32.xlu1 %v2514_v63, %s2586_s18 }
 0x765   :  { %v2516_v1 = vpop.eup %2515 }
 0x766   :  { %655 = vrot.lane.b32.xlu0 %v2516_v1, %s2586_s18 }
 0x7d6   :  { %v547_v2 = vpop.permute.xlu1 %546 }
 0x7d7   :  { %v2812_v3 = vmul.f32 %v547_v2, %v531_v50 }
 0x7d8   :  { %v656_v7 = vpop.permute.xlu0 %655 }
 0x7d9   :  { %v663_v6 = vrot.slane %v2812_v3, 4  ;;  %v658_v8 = vmul.f32 %v656_v7, %v637_v53 }
 0x7db   :  { %664 = vrot.lane.b32.xlu0 %v663_v6, %s2586_s18  ;;  %660 = vrot.lane.b32.xlu1 %v658_v8, %s2587_s3  ;;  %v769_v9 = vrot.slane %v658_v8, 4 }
 0x7df   :  { %770 = vrot.lane.b32.xlu1 %v769_v9, %s2587_s3 }
 0x84d   :  { %v665_v11 = vpop.permute.xlu0 %664  ;;  %v661_v12 = vpop.permute.xlu1 %660 }
 0x84e   :  { %v667_v14 = vsel %vm134_vm2, %v661_v12, %v665_v11 }
 0x84f   :  { %v669_v16 = vrot.slane %v667_v14, 4 }
 0x851   :  { %v771_v17 = vpop.permute.xlu1 %770  ;;  %2167 = vmatmul.mubr.msk.f32.vlgmr.msra.gmra.mrb[6].mxu0 %vm242_vm3, %v669_v16 }
 0x852   :  { %2178 = vmatmul.mubr.msk.f32.vlgmr.msra.gmra.mrb[6].mxu1 %vm134_vm2, %v771_v17  ;;  %2404 = vmatpush3.bf16.msra.mxu0 %v2645_v5 }
 0x853   :  { %2392 = vmatpush3.bf16.msra.mxu1 %v2699_v32  ;;  %2405 = vmatprep.subr.bf16.mxu0 %v2583_v0 }
 0x854   :  { %2393 = vmatprep.subr.bf16.mxu1 %v2583_v0  ;;  %2196 = vmatprep.mubr.msk.f32.mxu1 %vm2584_vm1, %v2585_v4 }
 0x855   :  { %2207 = vmatprep.mubr.msk.f32.mxu0 %vm2584_vm1, %v2585_v4 }
 0x856   :  { %2407 = vmatpush3.bf16.msra.mxu0 %v2662_v10 }
 0x857   :  { %2395 = vmatpush3.bf16.msra.mxu1 %v2705_v34  ;;  %2408 = vmatprep.subr.bf16.mxu0 %v2583_v0 }
 0x858   :  { %2396 = vmatprep.subr.bf16.mxu1 %v2583_v0 }
 0x85b   :  { %2398 = vmatpush3.bf16.msra.mxu1 %v2715_v37 }
 0x85c   :  { %2399 = vmatprep.subr.bf16.mxu1 %v2583_v0 }
 0x85f   :  { %2401 = vmatpush3.bf16.msra.mxu1 %v2726_v41 }
 0x860   :  { %2420 = vmatprep.subr.bf16.mxu1 %v2583_v0 }
 0x924   :  { %v738_v18 = vpop.f32.mrb[6].mxu0 }
 0x925   :  { %v739_v19 = vadd.f32 %v2754_v46, %v738_v18  ;;  %v2168_v21 = vpop.f32.mrb[7].mxu0  ;;  %v840_v22 = vpop.f32.mrb[6].mxu1 }
 0x926   :  { %v845_v23 = vrot.slane %v840_v22, 2  ;;  %v2179_v24 = vpop.f32.mrb[7].mxu1 }
 0x927   :  { %2517 = vtanh.f32 %v739_v19  ;;  %v742_v28 = vmul.f32 0.5, %v739_v19 }
 0x928   :  { %v847_v25 = vadd.f32 %v845_v23, %v2682_v15 }
 0x92a   :  { %2519 = vtanh.f32 %v847_v25  ;;  %v848_v29 = vmul.f32 0.5, %v847_v25 }
 0x92b   :  { %2521 = vtanh.f32 %v742_v28 }
 0x92c   :  { %2523 = vtanh.f32 %v848_v29 }
 0x931   :  { %v2518_v26 = vpop.eup %2517 }
 0x932   :  { %749 = vrot.lane.b32.xlu0 %v2518_v26, %s2586_s18 }
 0x934   :  { %v2520_v27 = vpop.eup %2519 }
 0x935   :  { %858 = vrot.lane.b32.xlu1 %v2520_v27, %s2586_s18  ;;  %v2522_v30 = vpop.eup %2521 }
 0x936   :  { %v2524_v31 = vpop.eup %2523  ;;  %v744_v33 = vmul.f32 0.5, %v2522_v30 }
 0x937   :  { %v850_v35 = vmul.f32 0.5, %v2524_v31 }
 0x938   :  { %v745_v36 = vadd.f32 0.5, %v744_v33 }
 0x939   :  { %v851_v40 = vadd.f32 0.5, %v850_v35 }
 0x93a   :  { %v747_v43 = vmul.f32 %v745_v36, %v2804_v59 }
 0x93b   :  { %v856_v48 = vmul.f32 %v854_v44, %v851_v40 }
 0x9a4   :  { %v750_v38 = vpop.permute.xlu0 %749 }
 0x9a5   :  { %v752_v39 = vmul.f32 %v750_v38, %v745_v36 }
 0x9a7   :  { %v859_v15 = vpop.permute.xlu1 %858  ;;  %754 = vrot.lane.b32.xlu0 %v752_v39, %s2587_s3 }
 0x9a8   :  { %v861_v42 = vmul.f32 %v859_v15, %v851_v40 }
 0x9aa   :  { %863 = vrot.lane.b32.xlu1 %v861_v42, %s2587_s3 }
 0xa19   :  { %v755_v45 = vpop.permute.xlu0 %754 }
 0xa1a   :  { %v2845_v47 = vadd.f32 %v755_v45, %v747_v43 }
 0xa1c   :  { %2525 = vtanh.f32 %v2845_v47  ;;  %v864_v49 = vpop.permute.xlu1 %863 }
 0xa1d   :  { %v2848_v50 = vadd.f32 %v864_v49, %v856_v48 }
 0xa1f   :  { %2527 = vtanh.f32 %v2848_v50  ;;  %v1065_v28 = vrot.slane %v2848_v50, 6 }
 0xa26   :  { %v2526_v51 = vpop.eup %2525 }
 0xa27   :  { %760 = vrot.lane.b32.xlu0 %v2526_v51, %s2586_s18 }
 0xa29   :  { %v2528_v52 = vpop.eup %2527 }
 0xa2a   :  { %869 = vrot.lane.b32.xlu1 %v2528_v52, %s2586_s18 }
 0xa99   :  { %v761_v53 = vpop.permute.xlu0 %760 }
 0xa9a   :  { %v2853_v54 = vmul.f32 %v761_v53, %v745_v36 }
 0xa9c   :  { %v877_v55 = vrot.slane %v2853_v54, 2  ;;  %v870_v56 = vpop.permute.xlu1 %869 }
 0xa9d   :  { %v872_v57 = vmul.f32 %v870_v56, %v851_v40 }
 0xa9e   :  { %878 = vrot.lane.b32.xlu1 %v877_v55, %s2586_s18 }
 0xa9f   :  { %874 = vrot.lane.b32.xlu0 %v872_v57, %s2587_s3  ;;  %v983_v58 = vrot.slane %v872_v57, 6 }
 0xaa3   :  { %984 = vrot.lane.b32.xlu0 %v983_v58, %s2587_s3 }
 0xb10   :  { %v879_v59 = vpop.permute.xlu1 %878 }
 0xb11   :  { %v875_v60 = vpop.permute.xlu0 %874 }
 0xb12   :  { %v881_v61 = vsel %vm134_vm2, %v875_v60, %v879_v59 }
 0xb13   :  { %v883_v62 = vrot.slane %v881_v61, 6 }
 0xb15   :  { %2197 = vmatmul.mubr.msk.f32.vlgmr.msra.gmra.mrb[8].mxu1 %vm242_vm3, %v883_v62  ;;  %v985_v63 = vpop.permute.xlu0 %984 }
 0xb16   :  { %2208 = vmatmul.mubr.msk.f32.vlgmr.msra.gmra.mrb[8].mxu0 %vm134_vm2, %v985_v63  ;;  %2422 = vmatpush3.bf16.msra.mxu1 %v2645_v5 }
 0xb17   :  { %2410 = vmatpush3.bf16.msra.mxu0 %v2699_v32  ;;  %2423 = vmatprep.subr.bf16.mxu1 %v2583_v0 }
 0xb18   :  { %2411 = vmatprep.subr.bf16.mxu0 %v2583_v0  ;;  %2237 = vmatprep.mubr.msk.f32.mxu1 %vm2584_vm1, %v2585_v4 }
 0xb19   :  { %2226 = vmatprep.mubr.msk.f32.mxu0 %vm2584_vm1, %v2585_v4 }
 0xb1a   :  { %2425 = vmatpush3.bf16.msra.mxu1 %v2662_v10 }
 0xb1b   :  { %2413 = vmatpush3.bf16.msra.mxu0 %v2705_v34  ;;  %2426 = vmatprep.subr.bf16.mxu1 %v2583_v0 }
 0xb1c   :  { %2414 = vmatprep.subr.bf16.mxu0 %v2583_v0 }
 0xb1f   :  { %2416 = vmatpush3.bf16.msra.mxu0 %v2715_v37 }
 0xb20   :  { %2417 = vmatprep.subr.bf16.mxu0 %v2583_v0 }
 0xb23   :  { %2419 = vmatpush3.bf16.msra.mxu0 %v2726_v41 }
 0xb24   :  { %2438 = vmatprep.subr.bf16.mxu0 %v2583_v0 }
 0xbe8   :  { %v952_v1 = vpop.f32.mrb[8].mxu1 }
 0xbe9   :  { %v953_v2 = vadd.f32 %v2754_v46, %v952_v1  ;;  %v2198_v6 = vpop.f32.mrb[9].mxu1  ;;  %v1054_v7 = vpop.f32.mrb[8].mxu0 }
 0xbea   :  { %v1058_v8 = vadd.f32 %v1054_v7, %v2680_v13  ;;  %v2209_v9 = vpop.f32.mrb[9].mxu0 }
 0xbeb   :  { %2529 = vtanh.f32 %v953_v2  ;;  %v956_v14 = vmul.f32 0.5, %v953_v2 }
 0xbec   :  { %2531 = vtanh.f32 %v1058_v8  ;;  %v1059_v16 = vmul.f32 0.5, %v1058_v8 }
 0xbed   :  { %2533 = vtanh.f32 %v956_v14 }
 0xbee   :  { %2535 = vtanh.f32 %v1059_v16 }
 0xbf5   :  { %v2530_v11 = vpop.eup %2529 }
 0xbf6   :  { %v2532_v12 = vpop.eup %2531  ;;  %963 = vrot.lane.b32.xlu1 %v2530_v11, %s2586_s18 }
 0xbf7   :  { %1069 = vrot.lane.b32.xlu0 %v2532_v12, %s2586_s18  ;;  %v2534_v17 = vpop.eup %2533 }
 0xbf8   :  { %v2536_v18 = vpop.eup %2535  ;;  %v958_v19 = vmul.f32 0.5, %v2534_v17 }
 0xbf9   :  { %v1061_v21 = vmul.f32 0.5, %v2536_v18 }
 0xbfa   :  { %v959_v22 = vadd.f32 0.5, %v958_v19 }
 0xbfb   :  { %v1062_v24 = vadd.f32 0.5, %v1061_v21 }
 0xbfc   :  { %v961_v29 = vmul.f32 %v959_v22, %v2845_v47 }
 0xbfd   :  { %v1067_v31 = vmul.f32 %v1065_v28, %v1062_v24 }
 0xc68   :  { %v964_v23 = vpop.permute.xlu1 %963 }
 0xc69   :  { %v966_v25 = vmul.f32 %v964_v23, %v959_v22  ;;  %v1070_v26 = vpop.permute.xlu0 %1069 }
 0xc6a   :  { %v1072_v27 = vmul.f32 %v1070_v26, %v1062_v24 }
 0xc6b   :  { %968 = vrot.lane.b32.xlu1 %v966_v25, %s2587_s3 }
 0xc6c   :  { %1074 = vrot.lane.b32.xlu0 %v1072_v27, %s2587_s3 }
 0xcdd   :  { %v969_v30 = vpop.permute.xlu1 %968 }
 0xcde   :  { %v2886_v33 = vadd.f32 %v969_v30, %v961_v29  ;;  %v1075_v35 = vpop.permute.xlu0 %1074 }
 0xcdf   :  { %v2888_v36 = vadd.f32 %v1075_v35, %v1067_v31 }
 0xce0   :  { %2537 = vtanh.f32 %v2886_v33 }
 0xce1   :  { %2539 = vtanh.f32 %v2888_v36  ;;  %v1274_v11 = vrot.slane %v2888_v36, 6 }
 0xcea   :  { %v2538_v38 = vpop.eup %2537 }
 0xceb   :  { %v2540_v39 = vpop.eup %2539  ;;  %974 = vrot.lane.b32.xlu1 %v2538_v38, %s2586_s18 }
 0xcec   :  { %1080 = vrot.lane.b32.xlu0 %v2540_v39, %s2586_s18 }
 0xd5d   :  { %v975_v40 = vpop.permute.xlu1 %974 }
 0xd5e   :  { %v2894_v15 = vmul.f32 %v975_v40, %v959_v22  ;;  %v1081_v42 = vpop.permute.xlu0 %1080 }
 0xd5f   :  { %v1083_v43 = vmul.f32 %v1081_v42, %v1062_v24 }
 0xd60   :  { %1088 = vrot.lane.b32.xlu0 %v2894_v15, %s2586_s18 }
 0xd61   :  { %1085 = vrot.lane.b32.xlu1 %v1083_v43, %s2587_s3 }
 0xdd2   :  { %v1089_v44 = vpop.permute.xlu0 %1088 }
 0xdd3   :  { %v1086_v45 = vpop.permute.xlu1 %1085 }
 0xdd4   :  { %v1091_v47 = vsel %vm134_vm2, %v1086_v45, %v1089_v44  ;;  %2238 = vmatmul.mubr.msk.f32.vlgmr.msra.gmra.mrb[10].mxu1 %vm134_vm2, %v1086_v45 }
 0xdd5   :  { %2227 = vmatmul.mubr.msk.f32.vlgmr.msra.gmra.mrb[10].mxu0 %vm242_vm3, %v1091_v47  ;;  %2428 = vmatpush3.bf16.msra.mxu1 %v2699_v32 }
 0xdd6   :  { %2429 = vmatprep.subr.bf16.mxu1 %v2583_v0  ;;  %2440 = vmatpush3.bf16.msra.mxu0 %v2645_v5 }
 0xdd7   :  { %2441 = vmatprep.subr.bf16.mxu0 %v2583_v0  ;;  %2256 = vmatprep.mubr.msk.f32.mxu1 %vm2584_vm1, %v2585_v4 }
 0xdd8   :  { %2267 = vmatprep.mubr.msk.f32.mxu0 %vm2584_vm1, %v2585_v4 }
 0xdd9   :  { %2431 = vmatpush3.bf16.msra.mxu1 %v2705_v34 }
 0xdda   :  { %2432 = vmatprep.subr.bf16.mxu1 %v2583_v0  ;;  %2443 = vmatpush3.bf16.msra.mxu0 %v2662_v10 }
 0xddb   :  { %2444 = vmatprep.subr.bf16.mxu0 %v2583_v0 }
 0xddd   :  { %2434 = vmatpush3.bf16.msra.mxu1 %v2715_v37 }
 0xdde   :  { %2435 = vmatprep.subr.bf16.mxu1 %v2583_v0 }
 0xde1   :  { %2437 = vmatpush3.bf16.msra.mxu1 %v2726_v41 }
 0xde2   :  { %2456 = vmatprep.subr.bf16.mxu1 %v2583_v0 }
 0xea7   :  { %v1260_v48 = vpop.f32.mrb[10].mxu1 }
 0xea8   :  { %v1265_v49 = vrot.slane %v1260_v48, 6  ;;  %v1161_v50 = vpop.f32.mrb[10].mxu0  ;;  %v2239_v51 = vpop.f32.mrb[11].mxu1 }
 0xea9   :  { %v1162_v52 = vadd.f32 %v2754_v46, %v1161_v50  ;;  %v2228_v53 = vpop.f32.mrb[11].mxu0 }
 0xeaa   :  { %v1267_v55 = vadd.f32 %v1265_v49, %v2680_v13 }
 0xeab   :  { %2541 = vtanh.f32 %v1162_v52  ;;  %v1165_v58 = vmul.f32 0.5, %v1162_v52 }
 0xeac   :  { %2543 = vtanh.f32 %v1267_v55  ;;  %v1268_v59 = vmul.f32 0.5, %v1267_v55 }
 0xead   :  { %2545 = vtanh.f32 %v1165_v58 }
 0xeae   :  { %2547 = vtanh.f32 %v1268_v59 }
 0xeb5   :  { %v2542_v56 = vpop.eup %2541 }
 0xeb6   :  { %v2544_v57 = vpop.eup %2543  ;;  %1172 = vrot.lane.b32.xlu1 %v2542_v56, %s2586_s18 }
 0xeb7   :  { %1278 = vrot.lane.b32.xlu0 %v2544_v57, %s2586_s18  ;;  %v2546_v60 = vpop.eup %2545 }
 0xeb8   :  { %v2548_v61 = vpop.eup %2547  ;;  %v1167_v62 = vmul.f32 0.5, %v2546_v60 }
 0xeb9   :  { %v1270_v63 = vmul.f32 0.5, %v2548_v61 }
 0xeba   :  { %v1168_v1 = vadd.f32 0.5, %v1167_v62 }
 0xebb   :  { %v1271_v6 = vadd.f32 0.5, %v1270_v63 }
 0xebc   :  { %v1170_v12 = vmul.f32 %v1168_v1, %v2886_v33 }
 0xebd   :  { %v1276_v16 = vmul.f32 %v1274_v11, %v1271_v6 }
 0xf28   :  { %v1173_v2 = vpop.permute.xlu1 %1172 }
 0xf29   :  { %v1175_v7 = vmul.f32 %v1173_v2, %v1168_v1  ;;  %v1279_v8 = vpop.permute.xlu0 %1278 }
 0xf2a   :  { %v1281_v9 = vmul.f32 %v1279_v8, %v1271_v6 }
 0xf2b   :  { %1177 = vrot.lane.b32.xlu1 %v1175_v7, %s2587_s3 }
 0xf2c   :  { %1283 = vrot.lane.b32.xlu0 %v1281_v9, %s2587_s3 }
 0xf9d   :  { %v1178_v14 = vpop.permute.xlu1 %1177 }
 0xf9e   :  { %v2926_v17 = vadd.f32 %v1178_v14, %v1170_v12  ;;  %v1284_v18 = vpop.permute.xlu0 %1283 }
 0xf9f   :  { %v2928_v19 = vadd.f32 %v1284_v18, %v1276_v16 }
 0xfa0   :  { %2549 = vtanh.f32 %v2926_v17 }
 0xfa1   :  { %2551 = vtanh.f32 %v2928_v19  ;;  %v1488_v60 = vrot.slane %v2928_v19, 6 }
 0xfaa   :  { %v2550_v21 = vpop.eup %2549 }
 0xfab   :  { %v2552_v22 = vpop.eup %2551  ;;  %1183 = vrot.lane.b32.xlu1 %v2550_v21, %s2586_s18 }
 0xfac   :  { %1289 = vrot.lane.b32.xlu0 %v2552_v22, %s2586_s18 }
0x101d   :  { %v1184_v23 = vpop.permute.xlu1 %1183 }
0x101e   :  { %v2934_v24 = vmul.f32 %v1184_v23, %v1168_v1  ;;  %v1290_v25 = vpop.permute.xlu0 %1289 }
0x101f   :  { %v1292_v26 = vmul.f32 %v1290_v25, %v1271_v6 }
0x1020   :  { %v1297_v27 = vrot.slane %v2934_v24, 6 }
0x1021   :  { %1294 = vrot.lane.b32.xlu1 %v1292_v26, %s2587_s3  ;;  %v1403_v28 = vrot.slane %v1292_v26, 2 }
0x1022   :  { %1298 = vrot.lane.b32.xlu0 %v1297_v27, %s2586_s18 }
0x1025   :  { %1404 = vrot.lane.b32.xlu1 %v1403_v28, %s2587_s3 }
0x1093   :  { %v1295_v29 = vpop.permute.xlu1 %1294 }
0x1094   :  { %v1299_v30 = vpop.permute.xlu0 %1298 }
0x1095   :  { %v1301_v31 = vsel %vm134_vm2, %v1295_v29, %v1299_v30 }
0x1096   :  { %v1303_v33 = vrot.slane %v1301_v31, 2 }
0x1097   :  { %v1405_v35 = vpop.permute.xlu1 %1404 }
0x1098   :  { %2257 = vmatmul.mubr.msk.f32.vlgmr.msra.gmra.mrb[12].mxu1 %vm242_vm3, %v1303_v33  ;;  %2268 = vmatmul.mubr.msk.f32.vlgmr.msra.gmra.mrb[12].mxu0 %vm134_vm2, %v1405_v35 }
0x1099   :  { %2446 = vmatpush3.bf16.msra.mxu0 %v2699_v32  ;;  %2458 = vmatpush3.bf16.msra.mxu1 %v2645_v5 }
0x109a   :  { %2447 = vmatprep.subr.bf16.mxu0 %v2583_v0  ;;  %2459 = vmatprep.subr.bf16.mxu1 %v2583_v0 }
0x109b   :  { %2286 = vmatprep.mubr.msk.f32.mxu0 %vm2584_vm1, %v2585_v4  ;;  %2297 = vmatprep.mubr.msk.f32.mxu1 %vm2584_vm1, %v2585_v4 }
0x109d   :  { %2449 = vmatpush3.bf16.msra.mxu0 %v2705_v34  ;;  %2461 = vmatpush3.bf16.msra.mxu1 %v2662_v10 }
0x109e   :  { %2450 = vmatprep.subr.bf16.mxu0 %v2583_v0  ;;  %2462 = vmatprep.subr.bf16.mxu1 %v2583_v0 }
0x10a1   :  { %2452 = vmatpush3.bf16.msra.mxu0 %v2715_v37 }
0x10a2   :  { %2453 = vmatprep.subr.bf16.mxu0 %v2583_v0 }
0x10a5   :  { %2455 = vmatpush3.bf16.msra.mxu0 %v2726_v41 }
0x116b   :  { %v1372_v5 = vpop.f32.mrb[12].mxu1  ;;  %v1474_v36 = vpop.f32.mrb[12].mxu0 }
0x116c   :  { %v1373_v38 = vadd.f32 %v2754_v46, %v1372_v5  ;;  %v1479_v39 = vrot.slane %v1474_v36, 4  ;;  %v2258_v40 = vpop.f32.mrb[13].mxu1  ;;  %v2269_v42 = vpop.f32.mrb[13].mxu0 }
0x116e   :  { %2553 = vtanh.f32 %v1373_v38  ;;  %v1481_v10 = vadd.f32 %v1479_v39, %v2680_v13  ;;  %v1376_v45 = vmul.f32 0.5, %v1373_v38 }
0x1170   :  { %2555 = vtanh.f32 %v1481_v10  ;;  %v1482_v47 = vmul.f32 0.5, %v1481_v10 }
0x1171   :  { %2557 = vtanh.f32 %v1376_v45 }
0x1172   :  { %2559 = vtanh.f32 %v1482_v47 }
0x1178   :  { %v2554_v43 = vpop.eup %2553 }
0x1179   :  { %1383 = vrot.lane.b32.xlu0 %v2554_v43, %s2586_s18 }
0x117a   :  { %v2556_v44 = vpop.eup %2555 }
0x117b   :  { %1492 = vrot.lane.b32.xlu1 %v2556_v44, %s2586_s18  ;;  %v2558_v48 = vpop.eup %2557 }
0x117c   :  { %v2560_v49 = vpop.eup %2559  ;;  %v1378_v50 = vmul.f32 0.5, %v2558_v48 }
0x117d   :  { %v1484_v51 = vmul.f32 0.5, %v2560_v49 }
0x117e   :  { %v1379_v52 = vadd.f32 0.5, %v1378_v50 }
0x117f   :  { %v1485_v56 = vadd.f32 0.5, %v1484_v51 }
0x1180   :  { %v1381_v59 = vmul.f32 %v1379_v52, %v2926_v17 }
0x1181   :  { %v1490_v63 = vmul.f32 %v1488_v60, %v1485_v56 }
0x11eb   :  { %v1384_v53 = vpop.permute.xlu0 %1383 }
0x11ec   :  { %v1386_v55 = vmul.f32 %v1384_v53, %v1379_v52 }
0x11ed   :  { %v1493_v57 = vpop.permute.xlu1 %1492 }
0x11ee   :  { %1388 = vrot.lane.b32.xlu0 %v1386_v55, %s2587_s3  ;;  %v1495_v58 = vmul.f32 %v1493_v57, %v1485_v56 }
0x11f0   :  { %1497 = vrot.lane.b32.xlu1 %v1495_v58, %s2587_s3 }
0x1260   :  { %v1389_v61 = vpop.permute.xlu0 %1388 }
0x1261   :  { %v2966_v62 = vadd.f32 %v1389_v61, %v1381_v59 }
0x1262   :  { %v1498_v1 = vpop.permute.xlu1 %1497 }
0x1263   :  { %2561 = vtanh.f32 %v2966_v62  ;;  %v2969_v2 = vadd.f32 %v1498_v1, %v1490_v63 }
0x1265   :  { %2563 = vtanh.f32 %v2969_v2  ;;  %v1702_v42 = vrot.slane %v2969_v2, 6 }
0x126d   :  { %v2562_v6 = vpop.eup %2561 }
0x126e   :  { %1394 = vrot.lane.b32.xlu0 %v2562_v6, %s2586_s18 }
0x126f   :  { %v2564_v7 = vpop.eup %2563 }
0x1270   :  { %1503 = vrot.lane.b32.xlu1 %v2564_v7, %s2586_s18 }
0x12e0   :  { %v1395_v8 = vpop.permute.xlu0 %1394 }
0x12e1   :  { %v2974_v9 = vmul.f32 %v1395_v8, %v1379_v52 }
0x12e2   :  { %v1504_v12 = vpop.permute.xlu1 %1503 }
0x12e3   :  { %v1511_v11 = vrot.slane %v2974_v9, 4  ;;  %v1506_v14 = vmul.f32 %v1504_v12, %v1485_v56 }
0x12e5   :  { %1512 = vrot.lane.b32.xlu1 %v1511_v11, %s2586_s18  ;;  %1508 = vrot.lane.b32.xlu0 %v1506_v14, %s2587_s3  ;;  %v1617_v16 = vrot.slane %v1506_v14, 4 }
0x12e9   :  { %1618 = vrot.lane.b32.xlu0 %v1617_v16, %s2587_s3 }
0x1357   :  { %v1513_v17 = vpop.permute.xlu1 %1512  ;;  %v1509_v18 = vpop.permute.xlu0 %1508 }
0x1358   :  { %v1515_v19 = vsel %vm134_vm2, %v1509_v18, %v1513_v17 }
0x1359   :  { %v1517_v21 = vrot.slane %v1515_v19, 4  ;;  %v1834_v19 = vld [vmem:[%s3061_s6 + $0x8] sm:$0xff] }
0x135b   :  { %v1619_v22 = vpop.permute.xlu0 %1618  ;;  %2287 = vmatmul.mubr.msk.f32.vlgmr.msra.gmra.mrb[14].mxu0 %vm242_vm3, %v1517_v21 }
0x135c   :  { %2298 = vmatmul.mubr.msk.f32.vlgmr.msra.gmra.mrb[14].mxu1 %vm134_vm2, %v1619_v22 }
0x135d   :  { %2464 = vmatpush3.bf16.msra.mxu1 %v2699_v32  ;;  %2316 = vmatprep.mubr.msk.f32.mxu1 %vm2584_vm1, %v2585_v4 }
0x135e   :  { %2465 = vmatprep.subr.bf16.mxu1 %v2583_v0 }
0x1361   :  { %2467 = vmatpush3.bf16.msra.mxu1 %v2705_v34 }
0x1362   :  { %2468 = vmatprep.subr.bf16.mxu1 %v2583_v0 }
0x1365   :  { %2470 = vmatpush3.bf16.msra.mxu1 %v2715_v37 }
0x1366   :  { %2471 = vmatprep.subr.bf16.mxu1 %v2583_v0 }
0x1369   :  { %2473 = vmatpush3.bf16.msra.mxu1 %v2726_v41 }
0x142e   :  { %v1586_v23 = vpop.f32.mrb[14].mxu0 }
0x142f   :  { %v1587_v25 = vadd.f32 %v2754_v46, %v1586_v23  ;;  %v2288_v26 = vpop.f32.mrb[15].mxu0  ;;  %v1688_v32 = vpop.f32.mrb[14].mxu1 }
0x1430   :  { %v1693_v27 = vrot.slane %v1688_v32, 2  ;;  %v2299_v28 = vpop.f32.mrb[15].mxu1 }
0x1431   :  { %2565 = vtanh.f32 %v1587_v25  ;;  %v1590_v0 = vmul.f32 0.5, %v1587_v25 }
0x1432   :  { %v1695_v4 = vadd.f32 %v1693_v27, %v2680_v13 }
0x1434   :  { %2567 = vtanh.f32 %v1695_v4  ;;  %v1696_v37 = vmul.f32 0.5, %v1695_v4 }
0x1435   :  { %2569 = vtanh.f32 %v1590_v0 }
0x1436   :  { %2571 = vtanh.f32 %v1696_v37 }
0x143b   :  { %v2566_v34 = vpop.eup %2565 }
0x143c   :  { %1597 = vrot.lane.b32.xlu1 %v2566_v34, %s2586_s18  ;;  %v1950_v34 = vld [vmem:[%s3062_s7] ss:$0 sm:$0xff] }
0x143e   :  { %v2568_v29 = vpop.eup %2567 }
0x143f   :  { %1706 = vrot.lane.b32.xlu0 %v2568_v29, %s2586_s18  ;;  %v2570_v41 = vpop.eup %2569 }
0x1440   :  { %v2572_v30 = vpop.eup %2571  ;;  %v1592_v31 = vmul.f32 0.5, %v2570_v41 }
0x1441   :  { %v1698_v33 = vmul.f32 0.5, %v2572_v30 }
0x1442   :  { %v1593_v35 = vadd.f32 0.5, %v1592_v31 }
0x1443   :  { %v1699_v38 = vadd.f32 0.5, %v1698_v33 }
0x1444   :  { %v1595_v40 = vmul.f32 %v1593_v35, %v2966_v62 }
0x1445   :  { %v1704_v44 = vmul.f32 %v1702_v42, %v1699_v38 }
0x14ae   :  { %v1598_v5 = vpop.permute.xlu1 %1597 }
0x14af   :  { %v1600_v36 = vmul.f32 %v1598_v5, %v1593_v35 }
0x14b1   :  { %v1707_v13 = vpop.permute.xlu0 %1706  ;;  %1602 = vrot.lane.b32.xlu1 %v1600_v36, %s2587_s3 }
0x14b2   :  { %v1709_v39 = vmul.f32 %v1707_v13, %v1699_v38 }
0x14b4   :  { %1711 = vrot.lane.b32.xlu0 %v1709_v39, %s2587_s3 }
0x1523   :  { %v1603_v10 = vpop.permute.xlu1 %1602 }
0x1524   :  { %v1605_v43 = vadd.f32 %v1603_v10, %v1595_v40 }
0x1526   :  { %2573 = vtanh.f32 %v1605_v43  ;;  %v1712_v45 = vpop.permute.xlu0 %1711 }
0x1527   :  { %v1714_v47 = vadd.f32 %v1712_v45, %v1704_v44 }
0x1529   :  { %2575 = vtanh.f32 %v1714_v47 }
0x1530   :  { %v2574_v48 = vpop.eup %2573 }
0x1531   :  { %1608 = vrot.lane.b32.xlu1 %v2574_v48, %s2586_s18 }
0x1533   :  { %v2576_v49 = vpop.eup %2575 }
0x1534   :  { %1717 = vrot.lane.b32.xlu0 %v2576_v49, %s2586_s18 }
0x15a3   :  { %v1609_v50 = vpop.permute.xlu1 %1608 }
0x15a4   :  { %v1611_v51 = vmul.f32 %v1609_v50, %v1593_v35 }
0x15a6   :  { %v1725_v52 = vrot.slane %v1611_v51, 2  ;;  %v1718_v53 = vpop.permute.xlu0 %1717 }
0x15a7   :  { %v1720_v55 = vmul.f32 %v1718_v53, %v1699_v38 }
0x15a8   :  { %1726 = vrot.lane.b32.xlu0 %v1725_v52, %s2586_s18 }
0x15a9   :  { %1722 = vrot.lane.b32.xlu1 %v1720_v55, %s2587_s3 }
0x161a   :  { %v1727_v56 = vpop.permute.xlu0 %1726 }
0x161b   :  { %v1723_v57 = vpop.permute.xlu1 %1722 }
0x161c   :  { %v1729_v58 = vsel %vm134_vm2, %v1723_v57, %v1727_v56 }
0x161d   :  { %v1731_v59 = vrot.slane %v1729_v58, 6 }
0x161f   :  { %2317 = vmatmul.mubr.msk.f32.vlgmr.msra.gmra.mrb[16].mxu1 %vm242_vm3, %v1731_v59 }
0x16f2   :  { %v1800_v60 = vpop.f32.mrb[16].mxu1 }
0x16f3   :  { %v1801_v61 = vadd.f32 %v2754_v46, %v1800_v60  ;;  %v2318_v62 = vpop.f32.mrb[17].mxu1 }
0x16f5   :  { %2577 = vtanh.f32 %v1801_v61  ;;  %v1804_v1 = vmul.f32 0.5, %v1801_v61 }
0x16f7   :  { %2579 = vtanh.f32 %v1804_v1 }
0x16ff   :  { %v2578_v63 = vpop.eup %2577 }
0x1700   :  { %1811 = vrot.lane.b32.xlu1 %v2578_v63, %s2586_s18 }
0x1701   :  { %v2580_v2 = vpop.eup %2579 }
0x1702   :  { %v1806_v6 = vmul.f32 0.5, %v2580_v2 }
0x1704   :  { %v1807_v7 = vadd.f32 0.5, %v1806_v6 }
0x1706   :  { %v1809_v46 = vmul.f32 %v1807_v7, %v1605_v43 }
0x1772   :  { %v1812_v8 = vpop.permute.xlu1 %1811 }
0x1773   :  { %v1814_v11 = vmul.f32 %v1812_v8, %v1807_v7 }
0x1775   :  { %1816 = vrot.lane.b32.xlu0 %v1814_v11, %s2587_s3 }
0x1779   :  { %339 = vrot.lane.b32.xlu0 %v2771_v20, %s2587_s3 }
0x177d   :  { %765 = vrot.lane.b32.xlu0 %v2853_v54, %s2587_s3 }
0x1781   :  { %1188 = vrot.lane.b32.xlu0 %v2934_v24, %s2587_s3  ;;  %v1833_v24 = vld [vmem:[%s3061_s6] sm:$0xff] }
0x1782   :  { %v2474_v21 = vpack.c.bf16 %v1834_v19, %v1833_v24 }
0x1784   :  { %2475 = vmatprep.subr.bf16.mxu0 %v2474_v21 }
0x1785   :  { %1613 = vrot.lane.b32.xlu0 %v1611_v51, %s2587_s3  ;;  %2477 = vmatpush3.bf16.msra.mxu0 %v2474_v21 }
0x17e7   :  { %v1817_v12 = vpop.permute.xlu0 %1816 }
0x17e8   :  { %v1819_v14 = vadd.f32 %v1817_v12, %v1809_v46 }
0x17ea   :  { %2581 = vtanh.f32 %v1819_v14 }
0x17eb   :  { %v340_v16 = vpop.permute.xlu0 %339 }
0x17ec   :  { %343 = vst.msk [vmem:[#allocation2] sm:$0x3] %vm342_vm4, %v340_v16 }
0x17ef   :  { %v766_v17 = vpop.permute.xlu0 %765 }
0x17f0   :  { %768 = vst.msk [vmem:[#allocation2 + $0x4] sm:$0x3] %vm342_vm4, %v766_v17 }
0x17f3   :  { %v1189_v20 = vpop.permute.xlu0 %1188 }
0x17f4   :  { %v2582_v18 = vpop.eup %2581  ;;  %1191 = vst.msk [vmem:[#allocation2 + $0x8] sm:$0x3] %vm342_vm4, %v1189_v20 }
0x17f5   :  { %1822 = vrot.lane.b32.xlu1 %v2582_v18, %s2586_s18 }
0x17f7   :  { %v1614_v54 = vpop.permute.xlu0 %1613 }
0x17f8   :  { %1616 = vst.msk [vmem:[#allocation2 + $0xc] sm:$0x3] %vm342_vm4, %v1614_v54 }
0x17f9   :  { %551 = vrot.lane.b32.xlu1 %v2812_v3, %s2587_s3  ;;  %v1835_v3 = vld [vmem:[%s3061_s6 + $0x10] sm:$0xff] }
0x17fd   :  { %979 = vrot.lane.b32.xlu1 %v2894_v15, %s2587_s3  ;;  %v1836_v15 = vld [vmem:[%s3061_s6 + $0x18] sm:$0xff] }
0x1801   :  { %1399 = vrot.lane.b32.xlu1 %v2974_v9, %s2587_s3  ;;  %v2478_v9 = vpack.c.bf16 %v1836_v15, %v1835_v3 }
0x1803   :  { %2479 = vmatprep.subr.bf16.mxu0 %v2478_v9 }
0x1804   :  { %2481 = vmatpush3.bf16.msra.mxu0 %v2478_v9 }
0x1867   :  { %v1823_v22 = vpop.permute.xlu1 %1822 }
0x1868   :  { %v1825_v23 = vmul.f32 %v1823_v22, %v1807_v7 }
0x186a   :  { %1827 = vrot.lane.b32.xlu1 %v1825_v23, %s2587_s3 }
0x186b   :  { %v552_v25 = vpop.permute.xlu1 %551 }
0x186c   :  { %554 = vst.msk [vmem:[#allocation2 + $0x2] sm:$0x3] %vm342_vm4, %v552_v25 }
0x186f   :  { %v980_v26 = vpop.permute.xlu1 %979 }
0x1870   :  { %982 = vst.msk [vmem:[#allocation2 + $0x6] sm:$0x3] %vm342_vm4, %v980_v26 }
0x1873   :  { %v1400_v32 = vpop.permute.xlu1 %1399 }
0x1874   :  { %1402 = vst.msk [vmem:[#allocation2 + $0xa] sm:$0x3] %vm342_vm4, %v1400_v32 }
0x1877   :  { %v1831_v27 = vld [vmem:[#allocation2] sm:$0xff] }
0x1878   :  { %2327 = vmatprep.mubr.msk.f32.mxu0 %vm134_vm2, %v1831_v27 }
0x18dc   :  { %v1828_v28 = vpop.permute.xlu1 %1827 }
0x18dd   :  { %1830 = vst.msk [vmem:[#allocation2 + $0xe] sm:$0x3] %vm342_vm4, %v1828_v28 }
0x18e4   :  { %v1832_v4 = vld [vmem:[#allocation2 + $0x8] sm:$0xff] }
0x18e5   :  { %2328 = vmatmul.mubr.msk.f32.vlgmr.msra.gmra.mrb[16].mxu0 %vm134_vm2, %v1832_v4 }
0x19b8   :  { %v2329_v29 = vpop.f32.mrb[16].mxu0 }
0x19b9   :  { %v1922_v0 = vadd.f32 %v2329_v29, %v1950_v34  ;;  %v1916_v37 = vpop.f32.mrb[17].mxu0 }
0x19ba   :  { %v1917_v41 = vadd.f32 %v1950_v34, %v1916_v37 }
0x19bb   :  { %1926 = vst [vmem:[%s3063_s8 + $0x8] sm:$0xff] %v1922_v0 }
0x19bc   :  { %1925 = vst [vmem:[%s3063_s8] sm:$0xff] %v1917_v41 }

</bundles_post_ra>
